<compile_context>
chip_gen: v7x
topology: tpu7x:2x2x1
jax: 0.10.0
libtpu: 0.0.40
codegen_flags: <defaults>
</compile_context>

<pallas_src>
import functools

import jax
import jax.numpy as jnp
import numpy as np
from jax.experimental import pallas as pl
from jax.experimental.pallas import tpu as pltpu

# ---------------- small synthetic config ----------------
EMBED_SIZE = 8            # E   (so Eh = E/2 = 4, 2E = 16)
HEADS = 1                 # see note above
NUM_LAYERS = 2
N_BATCH = 2
L_Q = 8                   # target (query) sequence length
L_K = 8                   # encoder (key / value) sequence length
WINDOW = 4                # per-query attention window (trg_mask last dim)
LONGEST_WINDOW = L_K      # sentinel in trg_mask marking masked slots
LN_EPS = 1e-5


# ---------------- fused Pallas kernel ----------------
def fused_decoder_kernel(x_ref, sp_ref, enc_ref, mask_ref,
                         wq_ref, wk_ref, wv_ref, wfc_ref, bfc_ref, lnw_ref, lnb_ref,
                         fcw_ref, fcb_ref,
                         out_ref, attn_ref,
                         *, num_layers, sentinel, n_batch, seq_len):
    """Entire Decoder forward: NUM_LAYERS DecoderBlocks + fc_out, in one launch.

    x_ref    : (N*L, Eh)      target activations (batch folded into sublanes)
    sp_ref   : (N*L, 3*Eh)    space positions
    enc_ref  : (N*Lk, 2E)     encoder output (batch folded)
    mask_ref : (N*L, W) int32 windowed key indices (== sentinel -> masked slot)
    w*_ref   : per-layer weights stacked along a leading layer axis (VMEM-resident)
    fcw_ref  : (1, Eh), fcb_ref : (1, 1)   final Linear(Eh -> 1)
    out_ref  : (N, L)         lane-dense final output (wrapper reshapes to (N, L, 1))
    attn_ref : (N*L, W)       LAST layer's attention weights (earlier layers unused)
    """
    x2 = x_ref[...]                    # (NL, Eh)
    sp2 = sp_ref[...]                  # (NL, 3Eh)
    enc2 = enc_ref[...]                # (NLk, 2E)
    mask = mask_ref[...]               # (NL, W) int32

    nl, eh = x2.shape
    n, l = n_batch, seq_len
    lk = enc2.shape[0] // n

    # ---- mask work is identical for every layer -> hoisted out of the layer loop ----
    key_ids = jax.lax.broadcasted_iota(jnp.int32, (1, 1, lk), 2)           # (1,1,Lk)
    oh = (mask[:, :, None] == key_ids).astype(jnp.float32)                 # (NL,W,Lk)
    pad = mask == sentinel                                                 # (NL,W) bool

    attn = None
    for layer in range(num_layers):        # static unroll; weights fetched once, stay in VMEM
        wq = wq_ref[layer]                 # (2E, 2E)
        wk = wk_ref[layer]                 # (2E, 2E)
        wv = wv_ref[layer]                 # (Eh, Eh)
        wfc = wfc_ref[layer]               # (Eh, Eh)
        bfc = bfc_ref[layer]               # (1, Eh)
        lnw = lnw_ref[layer]               # (1, Eh)
        lnb = lnb_ref[layer]               # (1, Eh)

        # query = cat(x, space) @ Wq  -> split matmul (no lane concat), batch folded
        q2 = (jnp.dot(x2, wq[:eh, :], preferred_element_type=jnp.float32) +
              jnp.dot(sp2, wq[eh:, :], preferred_element_type=jnp.float32))   # (NL, 2E)
        k2 = jnp.dot(enc2, wk, preferred_element_type=jnp.float32)            # (NLk, 2E)
        v2 = jnp.dot(enc2[:, :eh], wv, preferred_element_type=jnp.float32)    # (NLk, Eh)

        # per-batch attention scores; L == Lk == 8 keeps these reshapes layout-trivial
        q3 = q2.reshape(n, l, -1)
        k3 = k2.reshape(n, lk, -1)
        v3 = v2.reshape(n, lk, -1)
        s3 = jnp.einsum('nld,nkd->nlk', q3, k3,
                        preferred_element_type=jnp.float32)                   # (N,L,Lk)
        s2 = s3.reshape(nl, lk)                                               # (NL,Lk)

        # torch.gather of scores -> one-hot select (exactly one non-zero per window slot)
        energy = jnp.sum(oh * s2[:, None, :], axis=-1)                        # (NL, W)
        energy = jnp.where(pad, jnp.float32(-1e20), energy)

        m = jnp.max(energy, axis=-1, keepdims=True)
        e = jnp.exp(energy - m)
        attn = e / jnp.sum(e, axis=-1, keepdims=True)                         # (NL, W)

        # gathered-value bmm -> scatter attention onto the full key axis, then matmul
        p2 = jnp.sum(attn[:, :, None] * oh, axis=1)                           # (NL, Lk)
        ctx3 = jnp.einsum('nlk,nke->nle', p2.reshape(n, l, lk), v3,
                          preferred_element_type=jnp.float32)                 # (N,L,Eh)
        ctx2 = ctx3.reshape(nl, eh)

        # SelfAttention.fc_out + residual with x (== query[:, :, :Eh]) + LayerNorm(Eh)
        # TODO(synk): nn.Dropout omitted (inference mode => identity).
        proj = jnp.dot(ctx2, wfc, preferred_element_type=jnp.float32) + bfc
        y = proj + x2
        mu = jnp.mean(y, axis=-1, keepdims=True)
        var = jnp.mean((y - mu) ** 2, axis=-1, keepdims=True)
        x2 = (y - mu) * jax.lax.rsqrt(var + LN_EPS) * lnw + lnb

    # Decoder.fc_out: Linear(Eh -> 1), emitted lane-dense as (N, L)
    x3 = x2.reshape(n, l, eh)
    out_ref[...] = jnp.sum(x3 * fcw_ref[...][None, :, :], axis=-1) + fcb_ref[...]
    attn_ref[...] = attn


# ---------------- wrapper ----------------
def decoder_forward(params, x, trg_time_pos, space_positions, enc_out, trg_mask,
                    enc_space_positions):
    # TimeEncoder: computed by the reference forward but its result is never used.
    _time_pos = jnp.cos(trg_time_pos[:, :, None] * params["time_basis_freq"][None, None, :]
                        + params["time_phase"][None, None, :])
    del _time_pos, enc_space_positions   # unused downstream, exactly as in PyTorch

    N, L, Eh = x.shape
    _, Lk, E2 = enc_out.shape
    W = trg_mask.shape[-1]
    num_layers = len(params["layers"])

    # Stack per-layer weights along a leading layer axis so the single fused kernel
    # statically indexes them; total weight bytes < 4 KB -> trivially VMEM-resident.
    stk = lambda i: jnp.stack([p[i] for p in params["layers"]])
    wq, wk, wv, wfc, bfc, lnw, lnb = (stk(i) for i in range(7))

    kern = functools.partial(fused_decoder_kernel, num_layers=num_layers,
                             sentinel=LONGEST_WINDOW, n_batch=N, seq_len=L)
    vmem = lambda: pl.BlockSpec(memory_space=pltpu.MemorySpace.VMEM)

    out_nl, attn_flat = pl.pallas_call(
        kern,
        in_specs=[vmem() for _ in range(13)],
        out_specs=[vmem(), vmem()],
        out_shape=[jax.ShapeDtypeStruct((N, L), jnp.float32),
                   jax.ShapeDtypeStruct((N * L, W), jnp.float32)],
    )(x.reshape(N * L, Eh),
      space_positions.reshape(N * L, 3 * Eh),
      enc_out.reshape(N * Lk, E2),
      trg_mask.reshape(N * L, W),
      wq, wk, wv, wfc, bfc, lnw, lnb,
      params["fc_w"].reshape(1, Eh),
      params["fc_b"])

    # Free layout plumbing back to the module's output shapes.
    return out_nl.reshape(N, L, 1), attn_flat.reshape(N, L, W)


# ---------------- deterministic parameter init ----------------
def init_params(key, E, num_layers):
    Eh, E2 = E // 2, 2 * E
    layers = []
    for _ in range(num_layers):
        key, *ks = jax.random.split(key, 8)
        layers.append((
            0.2 * jax.random.normal(ks[0], (E2, E2), jnp.float32),      # Wq  (in,out)
            0.2 * jax.random.normal(ks[1], (E2, E2), jnp.float32),      # Wk
            0.2 * jax.random.normal(ks[2], (Eh, Eh), jnp.float32),      # Wv
            0.2 * jax.random.normal(ks[3], (Eh, Eh), jnp.float32),      # fc_out W
            0.1 * jax.random.normal(ks[4], (1, Eh), jnp.float32),       # fc_out b
            1.0 + 0.1 * jax.random.normal(ks[5], (1, Eh), jnp.float32), # LN gamma
            0.1 * jax.random.normal(ks[6], (1, Eh), jnp.float32),       # LN beta
        ))
    key, k1, k2 = jax.random.split(key, 3)
    return {
        "layers": layers,
        "fc_w": 0.2 * jax.random.normal(k1, (Eh, 1), jnp.float32),
        "fc_b": 0.1 * jax.random.normal(k2, (1, 1), jnp.float32),
        "time_basis_freq": (1.0 / 10.0 ** jnp.linspace(1.0, 4.0, E)).astype(jnp.float32),
        "time_phase": jnp.zeros((E,), jnp.float32),
    }


# ---------------- pure-JAX reference (mirrors the PyTorch forward) ----------------
def ref_forward(params, x, trg_time_pos, space_positions, enc_out, trg_mask,
                enc_space_positions):
    N, L, Eh = x.shape
    weights = None
    for (wq, wk, wv, wfc, bfc, lnw, lnb) in params["layers"]:
        q = jnp.concatenate([x, space_positions], axis=-1) @ wq
        k = enc_out @ wk
        v = enc_out[:, :, :Eh] @ wv
        k_pad = jnp.concatenate([k, jnp.zeros((N, 1, k.shape[-1]), k.dtype)], axis=1)
        v_pad = jnp.concatenate([v, jnp.zeros((N, 1, Eh), v.dtype)], axis=1)
        k_g = jax.vmap(lambda kp, m: kp[m])(k_pad, trg_mask)            # (N,L,W,2E)
        v_g = jax.vmap(lambda vp, m: vp[m])(v_pad, trg_mask)            # (N,L,W,Eh)
        energy = jnp.einsum("nld,nlwd->nlw", q, k_g)
        energy = jnp.where(trg_mask == LONGEST_WINDOW, -1e20, energy)
        attn = jax.nn.softmax(energy, axis=-1)
        ctx = jnp.einsum("nlw,nlwd->nld", attn, v_g)
        y = ctx @ wfc + bfc + x
        mu = y.mean(-1, keepdims=True)
        var = ((y - mu) ** 2).mean(-1, keepdims=True)
        x = (y - mu) / jnp.sqrt(var + LN_EPS) * lnw + lnb
        weights = attn
    out = x @ params["fc_w"] + params["fc_b"]
    return out, weights


if __name__ == "__main__":
    E, Eh = EMBED_SIZE, EMBED_SIZE // 2
    key = jax.random.PRNGKey(0)
    kx, kt, ksp, ke, km1, km2, kesp, kpar = jax.random.split(key, 8)

    x = jax.random.normal(kx, (N_BATCH, L_Q, Eh), jnp.float32)
    trg_time_pos = jax.random.uniform(kt, (N_BATCH, L_Q), jnp.float32) * 10.0
    space_positions = jax.random.normal(ksp, (N_BATCH, L_Q, 3 * Eh), jnp.float32)
    enc_out = jax.random.normal(ke, (N_BATCH, L_K, 2 * E), jnp.float32)

    idx = jax.random.randint(km1, (N_BATCH, L_Q, WINDOW), 0, L_K)
    drop = jax.random.bernoulli(km2, 0.25, (N_BATCH, L_Q, WINDOW))
    trg_mask = jnp.where(drop, LONGEST_WINDOW, idx).astype(jnp.int32)
    trg_mask = trg_mask.at[:, :, 0].set(idx[:, :, 0].astype(jnp.int32))  # >=1 valid slot
    enc_space_positions = jax.random.normal(kesp, (N_BATCH, L_K, 2), jnp.float32)  # unused

    params = init_params(kpar, E, NUM_LAYERS)

    out, weights = decoder_forward(params, x, trg_time_pos, space_positions,
                                   enc_out, trg_mask, enc_space_positions)
    jax.block_until_ready((out, weights))

    ref_out, ref_w = ref_forward(params, x, trg_time_pos, space_positions,
                                 enc_out, trg_mask, enc_space_positions)
    np.testing.assert_allclose(np.asarray(out), np.asarray(ref_out), rtol=1e-3, atol=1e-3)
    np.testing.assert_allclose(np.asarray(weights), np.asarray(ref_w), rtol=1e-3, atol=1e-3)

    print("KERNEL_OK")
</pallas_src>

<mosaic_0001>
module attributes {stable_mosaic.version = 11 : i64} {
  func.func @fused_decoder_kernel(%arg0: memref<16x4xf32, #tpu.memory_space<vmem>>, %arg1: memref<16x12xf32, #tpu.memory_space<vmem>>, %arg2: memref<16x16xf32, #tpu.memory_space<vmem>>, %arg3: memref<16x4xi32, #tpu.memory_space<vmem>>, %arg4: memref<2x16x16xf32, #tpu.memory_space<vmem>>, %arg5: memref<2x16x16xf32, #tpu.memory_space<vmem>>, %arg6: memref<2x4x4xf32, #tpu.memory_space<vmem>>, %arg7: memref<2x4x4xf32, #tpu.memory_space<vmem>>, %arg8: memref<2x1x4xf32, #tpu.memory_space<vmem>>, %arg9: memref<2x1x4xf32, #tpu.memory_space<vmem>>, %arg10: memref<2x1x4xf32, #tpu.memory_space<vmem>>, %arg11: memref<1x4xf32, #tpu.memory_space<vmem>>, %arg12: memref<1x1xf32, #tpu.memory_space<vmem>>, %arg13: memref<2x8xf32, #tpu.memory_space<vmem>>, %arg14: memref<16x4xf32, #tpu.memory_space<vmem>>) attributes {dimension_semantics = [], scalar_prefetch = 0 : i64, scratch_operands = 0 : i64, tpu.core_type = #tpu.core_type<tc>} {
    %c0 = arith.constant 0 : index
    %c0_0 = arith.constant 0 : index
    %0 = vector.load %arg0[%c0, %c0_0] : memref<16x4xf32, #tpu.memory_space<vmem>>, vector<16x4xf32>
    %c0_1 = arith.constant 0 : index
    %c0_2 = arith.constant 0 : index
    %1 = vector.load %arg1[%c0_1, %c0_2] : memref<16x12xf32, #tpu.memory_space<vmem>>, vector<16x12xf32>
    %c0_3 = arith.constant 0 : index
    %c0_4 = arith.constant 0 : index
    %2 = vector.load %arg2[%c0_3, %c0_4] : memref<16x16xf32, #tpu.memory_space<vmem>>, vector<16x16xf32>
    %c0_5 = arith.constant 0 : index
    %c0_6 = arith.constant 0 : index
    %3 = vector.load %arg3[%c0_5, %c0_6] : memref<16x4xi32, #tpu.memory_space<vmem>>, vector<16x4xi32>
    %4 = tpu.iota {dimensions = array<i32: 2>} : vector<1x1x8xi32>
    %5 = vector.shape_cast %3 : vector<16x4xi32> to vector<16x4x1xi32>
    %6 = vector.broadcast %5 : vector<16x4x1xi32> to vector<16x4x8xi32>
    %7 = vector.broadcast %4 : vector<1x1x8xi32> to vector<16x4x8xi32>
    %8 = arith.cmpi eq, %6, %7 : vector<16x4x8xi32>
    %9 = arith.extui %8 : vector<16x4x8xi1> to vector<16x4x8xi32>
    %10 = arith.sitofp %9 : vector<16x4x8xi32> to vector<16x4x8xf32>
    %c8_i32 = arith.constant 8 : i32
    %11 = vector.broadcast %c8_i32 : i32 to vector<16x4xi32>
    %12 = arith.cmpi eq, %3, %11 : vector<16x4xi32>
    %c0_7 = arith.constant 0 : index
    %c0_8 = arith.constant 0 : index
    %c0_9 = arith.constant 0 : index
    %13 = vector.load %arg4[%c0_7, %c0_8, %c0_9] : memref<2x16x16xf32, #tpu.memory_space<vmem>>, vector<1x16x16xf32>
    %14 = vector.shape_cast %13 : vector<1x16x16xf32> to vector<16x16xf32>
    %c0_10 = arith.constant 0 : index
    %c0_11 = arith.constant 0 : index
    %c0_12 = arith.constant 0 : index
    %15 = vector.load %arg5[%c0_10, %c0_11, %c0_12] : memref<2x16x16xf32, #tpu.memory_space<vmem>>, vector<1x16x16xf32>
    %16 = vector.shape_cast %15 : vector<1x16x16xf32> to vector<16x16xf32>
    %c0_13 = arith.constant 0 : index
    %c0_14 = arith.constant 0 : index
    %c0_15 = arith.constant 0 : index
    %17 = vector.load %arg6[%c0_13, %c0_14, %c0_15] : memref<2x4x4xf32, #tpu.memory_space<vmem>>, vector<1x4x4xf32>
    %18 = vector.shape_cast %17 : vector<1x4x4xf32> to vector<4x4xf32>
    %c0_16 = arith.constant 0 : index
    %c0_17 = arith.constant 0 : index
    %c0_18 = arith.constant 0 : index
    %19 = vector.load %arg7[%c0_16, %c0_17, %c0_18] : memref<2x4x4xf32, #tpu.memory_space<vmem>>, vector<1x4x4xf32>
    %20 = vector.shape_cast %19 : vector<1x4x4xf32> to vector<4x4xf32>
    %c0_19 = arith.constant 0 : index
    %c0_20 = arith.constant 0 : index
    %c0_21 = arith.constant 0 : index
    %21 = vector.load %arg8[%c0_19, %c0_20, %c0_21] : memref<2x1x4xf32, #tpu.memory_space<vmem>>, vector<1x1x4xf32>
    %22 = vector.shape_cast %21 : vector<1x1x4xf32> to vector<1x4xf32>
    %c0_22 = arith.constant 0 : index
    %c0_23 = arith.constant 0 : index
    %c0_24 = arith.constant 0 : index
    %23 = vector.load %arg9[%c0_22, %c0_23, %c0_24] : memref<2x1x4xf32, #tpu.memory_space<vmem>>, vector<1x1x4xf32>
    %24 = vector.shape_cast %23 : vector<1x1x4xf32> to vector<1x4xf32>
    %c0_25 = arith.constant 0 : index
    %c0_26 = arith.constant 0 : index
    %c0_27 = arith.constant 0 : index
    %25 = vector.load %arg10[%c0_25, %c0_26, %c0_27] : memref<2x1x4xf32, #tpu.memory_space<vmem>>, vector<1x1x4xf32>
    %26 = vector.shape_cast %25 : vector<1x1x4xf32> to vector<1x4xf32>
    %27 = vector.extract_strided_slice %14 {offsets = [0, 0], sizes = [4, 16], strides = [1, 1]} : vector<16x16xf32> to vector<4x16xf32>
    %cst = arith.constant dense<0.000000e+00> : vector<16x16xf32>
    %28 = tpu.matmul %0, %27, %cst {dimension_numbers = #tpu.dot_dimension_numbers<[1], [0], [0], [1], [0, 0, 1, 1], [], []>} : vector<16x4xf32>, vector<4x16xf32>, vector<16x16xf32> -> vector<16x16xf32>
    %29 = vector.extract_strided_slice %14 {offsets = [4, 0], sizes = [12, 16], strides = [1, 1]} : vector<16x16xf32> to vector<12x16xf32>
    %cst_28 = arith.constant dense<0.000000e+00> : vector<16x16xf32>
    %30 = tpu.matmul %1, %29, %cst_28 {dimension_numbers = #tpu.dot_dimension_numbers<[1], [0], [0], [1], [0, 0, 1, 1], [], []>} : vector<16x12xf32>, vector<12x16xf32>, vector<16x16xf32> -> vector<16x16xf32>
    %31 = arith.addf %28, %30 : vector<16x16xf32>
    %cst_29 = arith.constant dense<0.000000e+00> : vector<16x16xf32>
    %32 = tpu.matmul %2, %16, %cst_29 {dimension_numbers = #tpu.dot_dimension_numbers<[1], [0], [0], [1], [0, 0, 1, 1], [], []>} : vector<16x16xf32>, vector<16x16xf32>, vector<16x16xf32> -> vector<16x16xf32>
    %33 = vector.extract_strided_slice %2 {offsets = [0, 0], sizes = [16, 4], strides = [1, 1]} : vector<16x16xf32> to vector<16x4xf32>
    %cst_30 = arith.constant dense<0.000000e+00> : vector<16x4xf32>
    %34 = tpu.matmul %33, %18, %cst_30 {dimension_numbers = #tpu.dot_dimension_numbers<[1], [0], [0], [1], [0, 0, 1, 1], [], []>} : vector<16x4xf32>, vector<4x4xf32>, vector<16x4xf32> -> vector<16x4xf32>
    %35 = vector.shape_cast %31 : vector<16x16xf32> to vector<2x8x16xf32>
    %36 = vector.shape_cast %32 : vector<16x16xf32> to vector<2x8x16xf32>
    %37 = vector.shape_cast %34 : vector<16x4xf32> to vector<2x8x4xf32>
    "tpu.trace_start"() <{level = 10 : i32, message = "nld,nkd->nlk"}> : () -> ()
    %cst_31 = arith.constant dense<0.000000e+00> : vector<2x8x8xf32>
    %38 = tpu.matmul %35, %36, %cst_31 {dimension_numbers = #tpu.dot_dimension_numbers<[2], [2], [1], [1], [0, 0, 0, 1, 1, 1], [0], [0]>} : vector<2x8x16xf32>, vector<2x8x16xf32>, vector<2x8x8xf32> -> vector<2x8x8xf32>
    "tpu.trace_stop"() : () -> ()
    %39 = vector.shape_cast %38 : vector<2x8x8xf32> to vector<16x8xf32>
    %40 = vector.shape_cast %39 : vector<16x8xf32> to vector<16x1x8xf32>
    %41 = vector.broadcast %40 : vector<16x1x8xf32> to vector<16x4x8xf32>
    %42 = arith.mulf %10, %41 : vector<16x4x8xf32>
    %cst_32 = arith.constant dense<0.000000e+00> : vector<16x4xf32>
    %43 = vector.multi_reduction <add>, %42, %cst_32 [2] : vector<16x4x8xf32> to vector<16x4xf32>
    %cst_33 = arith.constant -1.000000e+20 : f32
    %44 = vector.broadcast %cst_33 : f32 to vector<16x4xf32>
    %45 = arith.select %12, %44, %43 : vector<16x4xi1>, vector<16x4xf32>
    %cst_34 = arith.constant dense<0xFF800000> : vector<16xf32>
    %46 = vector.multi_reduction <maximumf>, %45, %cst_34 [1] : vector<16x4xf32> to vector<16xf32>
    %47 = vector.shape_cast %46 : vector<16xf32> to vector<16x1xf32>
    %48 = vector.broadcast %47 : vector<16x1xf32> to vector<16x4xf32>
    %49 = arith.subf %45, %48 : vector<16x4xf32>
    %50 = math.exp %49 : vector<16x4xf32>
    %cst_35 = arith.constant dense<0.000000e+00> : vector<16xf32>
    %51 = vector.multi_reduction <add>, %50, %cst_35 [1] : vector<16x4xf32> to vector<16xf32>
    %52 = vector.shape_cast %51 : vector<16xf32> to vector<16x1xf32>
    %53 = vector.broadcast %52 : vector<16x1xf32> to vector<16x4xf32>
    %54 = arith.divf %50, %53 : vector<16x4xf32>
    %55 = vector.shape_cast %54 : vector<16x4xf32> to vector<16x4x1xf32>
    %56 = vector.broadcast %55 : vector<16x4x1xf32> to vector<16x4x8xf32>
    %57 = arith.mulf %56, %10 : vector<16x4x8xf32>
    %cst_36 = arith.constant dense<0.000000e+00> : vector<16x8xf32>
    %58 = vector.multi_reduction <add>, %57, %cst_36 [1] : vector<16x4x8xf32> to vector<16x8xf32>
    %59 = vector.shape_cast %58 : vector<16x8xf32> to vector<2x8x8xf32>
    "tpu.trace_start"() <{level = 10 : i32, message = "nlk,nke->nle"}> : () -> ()
    %cst_37 = arith.constant dense<0.000000e+00> : vector<2x8x4xf32>
    %60 = tpu.matmul %59, %37, %cst_37 {dimension_numbers = #tpu.dot_dimension_numbers<[2], [1], [1], [2], [0, 0, 0, 1, 1, 2], [0], [0]>} : vector<2x8x8xf32>, vector<2x8x4xf32>, vector<2x8x4xf32> -> vector<2x8x4xf32>
    "tpu.trace_stop"() : () -> ()
    %61 = vector.shape_cast %60 : vector<2x8x4xf32> to vector<16x4xf32>
    %cst_38 = arith.constant dense<0.000000e+00> : vector<16x4xf32>
    %62 = tpu.matmul %61, %20, %cst_38 {dimension_numbers = #tpu.dot_dimension_numbers<[1], [0], [0], [1], [0, 0, 1, 1], [], []>} : vector<16x4xf32>, vector<4x4xf32>, vector<16x4xf32> -> vector<16x4xf32>
    %63 = vector.broadcast %22 : vector<1x4xf32> to vector<16x4xf32>
    %64 = arith.addf %62, %63 : vector<16x4xf32>
    %65 = arith.addf %64, %0 : vector<16x4xf32>
    %cst_39 = arith.constant dense<0.000000e+00> : vector<16xf32>
    %66 = vector.multi_reduction <add>, %65, %cst_39 [1] : vector<16x4xf32> to vector<16xf32>
    %67 = vector.shape_cast %66 : vector<16xf32> to vector<16x1xf32>
    %cst_40 = arith.constant 4.000000e+00 : f32
    %68 = vector.broadcast %cst_40 : f32 to vector<16x1xf32>
    %69 = arith.divf %67, %68 : vector<16x1xf32>
    %70 = vector.broadcast %69 : vector<16x1xf32> to vector<16x4xf32>
    %71 = arith.subf %65, %70 : vector<16x4xf32>
    %72 = arith.mulf %71, %71 : vector<16x4xf32>
    %cst_41 = arith.constant dense<0.000000e+00> : vector<16xf32>
    %73 = vector.multi_reduction <add>, %72, %cst_41 [1] : vector<16x4xf32> to vector<16xf32>
    %74 = vector.shape_cast %73 : vector<16xf32> to vector<16x1xf32>
    %cst_42 = arith.constant 4.000000e+00 : f32
    %75 = vector.broadcast %cst_42 : f32 to vector<16x1xf32>
    %76 = arith.divf %74, %75 : vector<16x1xf32>
    %77 = vector.broadcast %69 : vector<16x1xf32> to vector<16x4xf32>
    %78 = arith.subf %65, %77 : vector<16x4xf32>
    %cst_43 = arith.constant 9.99999974E-6 : f32
    %79 = vector.broadcast %cst_43 : f32 to vector<16x1xf32>
    %80 = arith.addf %76, %79 : vector<16x1xf32>
    %81 = math.rsqrt %80 : vector<16x1xf32>
    %82 = vector.broadcast %81 : vector<16x1xf32> to vector<16x4xf32>
    %83 = arith.mulf %78, %82 : vector<16x4xf32>
    %84 = vector.broadcast %24 : vector<1x4xf32> to vector<16x4xf32>
    %85 = arith.mulf %83, %84 : vector<16x4xf32>
    %86 = vector.broadcast %26 : vector<1x4xf32> to vector<16x4xf32>
    %87 = arith.addf %85, %86 : vector<16x4xf32>
    %c1 = arith.constant 1 : index
    %c0_44 = arith.constant 0 : index
    %c0_45 = arith.constant 0 : index
    %88 = vector.load %arg4[%c1, %c0_44, %c0_45] : memref<2x16x16xf32, #tpu.memory_space<vmem>>, vector<1x16x16xf32>
    %89 = vector.shape_cast %88 : vector<1x16x16xf32> to vector<16x16xf32>
    %c1_46 = arith.constant 1 : index
    %c0_47 = arith.constant 0 : index
    %c0_48 = arith.constant 0 : index
    %90 = vector.load %arg5[%c1_46, %c0_47, %c0_48] : memref<2x16x16xf32, #tpu.memory_space<vmem>>, vector<1x16x16xf32>
    %91 = vector.shape_cast %90 : vector<1x16x16xf32> to vector<16x16xf32>
    %c1_49 = arith.constant 1 : index
    %c0_50 = arith.constant 0 : index
    %c0_51 = arith.constant 0 : index
    %92 = vector.load %arg6[%c1_49, %c0_50, %c0_51] : memref<2x4x4xf32, #tpu.memory_space<vmem>>, vector<1x4x4xf32>
    %93 = vector.shape_cast %92 : vector<1x4x4xf32> to vector<4x4xf32>
    %c1_52 = arith.constant 1 : index
    %c0_53 = arith.constant 0 : index
    %c0_54 = arith.constant 0 : index
    %94 = vector.load %arg7[%c1_52, %c0_53, %c0_54] : memref<2x4x4xf32, #tpu.memory_space<vmem>>, vector<1x4x4xf32>
    %95 = vector.shape_cast %94 : vector<1x4x4xf32> to vector<4x4xf32>
    %c1_55 = arith.constant 1 : index
    %c0_56 = arith.constant 0 : index
    %c0_57 = arith.constant 0 : index
    %96 = vector.load %arg8[%c1_55, %c0_56, %c0_57] : memref<2x1x4xf32, #tpu.memory_space<vmem>>, vector<1x1x4xf32>
    %97 = vector.shape_cast %96 : vector<1x1x4xf32> to vector<1x4xf32>
    %c1_58 = arith.constant 1 : index
    %c0_59 = arith.constant 0 : index
    %c0_60 = arith.constant 0 : index
    %98 = vector.load %arg9[%c1_58, %c0_59, %c0_60] : memref<2x1x4xf32, #tpu.memory_space<vmem>>, vector<1x1x4xf32>
    %99 = vector.shape_cast %98 : vector<1x1x4xf32> to vector<1x4xf32>
    %c1_61 = arith.constant 1 : index
    %c0_62 = arith.constant 0 : index
    %c0_63 = arith.constant 0 : index
    %100 = vector.load %arg10[%c1_61, %c0_62, %c0_63] : memref<2x1x4xf32, #tpu.memory_space<vmem>>, vector<1x1x4xf32>
    %101 = vector.shape_cast %100 : vector<1x1x4xf32> to vector<1x4xf32>
    %102 = vector.extract_strided_slice %89 {offsets = [0, 0], sizes = [4, 16], strides = [1, 1]} : vector<16x16xf32> to vector<4x16xf32>
    %cst_64 = arith.constant dense<0.000000e+00> : vector<16x16xf32>
    %103 = tpu.matmul %87, %102, %cst_64 {dimension_numbers = #tpu.dot_dimension_numbers<[1], [0], [0], [1], [0, 0, 1, 1], [], []>} : vector<16x4xf32>, vector<4x16xf32>, vector<16x16xf32> -> vector<16x16xf32>
    %104 = vector.extract_strided_slice %89 {offsets = [4, 0], sizes = [12, 16], strides = [1, 1]} : vector<16x16xf32> to vector<12x16xf32>
    %cst_65 = arith.constant dense<0.000000e+00> : vector<16x16xf32>
    %105 = tpu.matmul %1, %104, %cst_65 {dimension_numbers = #tpu.dot_dimension_numbers<[1], [0], [0], [1], [0, 0, 1, 1], [], []>} : vector<16x12xf32>, vector<12x16xf32>, vector<16x16xf32> -> vector<16x16xf32>
    %106 = arith.addf %103, %105 : vector<16x16xf32>
    %cst_66 = arith.constant dense<0.000000e+00> : vector<16x16xf32>
    %107 = tpu.matmul %2, %91, %cst_66 {dimension_numbers = #tpu.dot_dimension_numbers<[1], [0], [0], [1], [0, 0, 1, 1], [], []>} : vector<16x16xf32>, vector<16x16xf32>, vector<16x16xf32> -> vector<16x16xf32>
    %108 = vector.extract_strided_slice %2 {offsets = [0, 0], sizes = [16, 4], strides = [1, 1]} : vector<16x16xf32> to vector<16x4xf32>
    %cst_67 = arith.constant dense<0.000000e+00> : vector<16x4xf32>
    %109 = tpu.matmul %108, %93, %cst_67 {dimension_numbers = #tpu.dot_dimension_numbers<[1], [0], [0], [1], [0, 0, 1, 1], [], []>} : vector<16x4xf32>, vector<4x4xf32>, vector<16x4xf32> -> vector<16x4xf32>
    %110 = vector.shape_cast %106 : vector<16x16xf32> to vector<2x8x16xf32>
    %111 = vector.shape_cast %107 : vector<16x16xf32> to vector<2x8x16xf32>
    %112 = vector.shape_cast %109 : vector<16x4xf32> to vector<2x8x4xf32>
    "tpu.trace_start"() <{level = 10 : i32, message = "nld,nkd->nlk"}> : () -> ()
    %cst_68 = arith.constant dense<0.000000e+00> : vector<2x8x8xf32>
    %113 = tpu.matmul %110, %111, %cst_68 {dimension_numbers = #tpu.dot_dimension_numbers<[2], [2], [1], [1], [0, 0, 0, 1, 1, 1], [0], [0]>} : vector<2x8x16xf32>, vector<2x8x16xf32>, vector<2x8x8xf32> -> vector<2x8x8xf32>
    "tpu.trace_stop"() : () -> ()
    %114 = vector.shape_cast %113 : vector<2x8x8xf32> to vector<16x8xf32>
    %115 = vector.shape_cast %114 : vector<16x8xf32> to vector<16x1x8xf32>
    %116 = vector.broadcast %115 : vector<16x1x8xf32> to vector<16x4x8xf32>
    %117 = arith.mulf %10, %116 : vector<16x4x8xf32>
    %cst_69 = arith.constant dense<0.000000e+00> : vector<16x4xf32>
    %118 = vector.multi_reduction <add>, %117, %cst_69 [2] : vector<16x4x8xf32> to vector<16x4xf32>
    %cst_70 = arith.constant -1.000000e+20 : f32
    %119 = vector.broadcast %cst_70 : f32 to vector<16x4xf32>
    %120 = arith.select %12, %119, %118 : vector<16x4xi1>, vector<16x4xf32>
    %cst_71 = arith.constant dense<0xFF800000> : vector<16xf32>
    %121 = vector.multi_reduction <maximumf>, %120, %cst_71 [1] : vector<16x4xf32> to vector<16xf32>
    %122 = vector.shape_cast %121 : vector<16xf32> to vector<16x1xf32>
    %123 = vector.broadcast %122 : vector<16x1xf32> to vector<16x4xf32>
    %124 = arith.subf %120, %123 : vector<16x4xf32>
    %125 = math.exp %124 : vector<16x4xf32>
    %cst_72 = arith.constant dense<0.000000e+00> : vector<16xf32>
    %126 = vector.multi_reduction <add>, %125, %cst_72 [1] : vector<16x4xf32> to vector<16xf32>
    %127 = vector.shape_cast %126 : vector<16xf32> to vector<16x1xf32>
    %128 = vector.broadcast %127 : vector<16x1xf32> to vector<16x4xf32>
    %129 = arith.divf %125, %128 : vector<16x4xf32>
    %130 = vector.shape_cast %129 : vector<16x4xf32> to vector<16x4x1xf32>
    %131 = vector.broadcast %130 : vector<16x4x1xf32> to vector<16x4x8xf32>
    %132 = arith.mulf %131, %10 : vector<16x4x8xf32>
    %cst_73 = arith.constant dense<0.000000e+00> : vector<16x8xf32>
    %133 = vector.multi_reduction <add>, %132, %cst_73 [1] : vector<16x4x8xf32> to vector<16x8xf32>
    %134 = vector.shape_cast %133 : vector<16x8xf32> to vector<2x8x8xf32>
    "tpu.trace_start"() <{level = 10 : i32, message = "nlk,nke->nle"}> : () -> ()
    %cst_74 = arith.constant dense<0.000000e+00> : vector<2x8x4xf32>
    %135 = tpu.matmul %134, %112, %cst_74 {dimension_numbers = #tpu.dot_dimension_numbers<[2], [1], [1], [2], [0, 0, 0, 1, 1, 2], [0], [0]>} : vector<2x8x8xf32>, vector<2x8x4xf32>, vector<2x8x4xf32> -> vector<2x8x4xf32>
    "tpu.trace_stop"() : () -> ()
    %136 = vector.shape_cast %135 : vector<2x8x4xf32> to vector<16x4xf32>
    %cst_75 = arith.constant dense<0.000000e+00> : vector<16x4xf32>
    %137 = tpu.matmul %136, %95, %cst_75 {dimension_numbers = #tpu.dot_dimension_numbers<[1], [0], [0], [1], [0, 0, 1, 1], [], []>} : vector<16x4xf32>, vector<4x4xf32>, vector<16x4xf32> -> vector<16x4xf32>
    %138 = vector.broadcast %97 : vector<1x4xf32> to vector<16x4xf32>
    %139 = arith.addf %137, %138 : vector<16x4xf32>
    %140 = arith.addf %139, %87 : vector<16x4xf32>
    %cst_76 = arith.constant dense<0.000000e+00> : vector<16xf32>
    %141 = vector.multi_reduction <add>, %140, %cst_76 [1] : vector<16x4xf32> to vector<16xf32>
    %142 = vector.shape_cast %141 : vector<16xf32> to vector<16x1xf32>
    %cst_77 = arith.constant 4.000000e+00 : f32
    %143 = vector.broadcast %cst_77 : f32 to vector<16x1xf32>
    %144 = arith.divf %142, %143 : vector<16x1xf32>
    %145 = vector.broadcast %144 : vector<16x1xf32> to vector<16x4xf32>
    %146 = arith.subf %140, %145 : vector<16x4xf32>
    %147 = arith.mulf %146, %146 : vector<16x4xf32>
    %cst_78 = arith.constant dense<0.000000e+00> : vector<16xf32>
    %148 = vector.multi_reduction <add>, %147, %cst_78 [1] : vector<16x4xf32> to vector<16xf32>
    %149 = vector.shape_cast %148 : vector<16xf32> to vector<16x1xf32>
    %cst_79 = arith.constant 4.000000e+00 : f32
    %150 = vector.broadcast %cst_79 : f32 to vector<16x1xf32>
    %151 = arith.divf %149, %150 : vector<16x1xf32>
    %152 = vector.broadcast %144 : vector<16x1xf32> to vector<16x4xf32>
    %153 = arith.subf %140, %152 : vector<16x4xf32>
    %cst_80 = arith.constant 9.99999974E-6 : f32
    %154 = vector.broadcast %cst_80 : f32 to vector<16x1xf32>
    %155 = arith.addf %151, %154 : vector<16x1xf32>
    %156 = math.rsqrt %155 : vector<16x1xf32>
    %157 = vector.broadcast %156 : vector<16x1xf32> to vector<16x4xf32>
    %158 = arith.mulf %153, %157 : vector<16x4xf32>
    %159 = vector.broadcast %99 : vector<1x4xf32> to vector<16x4xf32>
    %160 = arith.mulf %158, %159 : vector<16x4xf32>
    %161 = vector.broadcast %101 : vector<1x4xf32> to vector<16x4xf32>
    %162 = arith.addf %160, %161 : vector<16x4xf32>
    %163 = vector.shape_cast %162 : vector<16x4xf32> to vector<2x8x4xf32>
    %c0_81 = arith.constant 0 : index
    %c0_82 = arith.constant 0 : index
    %164 = vector.load %arg11[%c0_81, %c0_82] : memref<1x4xf32, #tpu.memory_space<vmem>>, vector<1x4xf32>
    %165 = vector.shape_cast %164 : vector<1x4xf32> to vector<1x1x4xf32>
    %166 = vector.broadcast %165 : vector<1x1x4xf32> to vector<2x8x4xf32>
    %167 = arith.mulf %163, %166 : vector<2x8x4xf32>
    %cst_83 = arith.constant dense<0.000000e+00> : vector<2x8xf32>
    %168 = vector.multi_reduction <add>, %167, %cst_83 [2] : vector<2x8x4xf32> to vector<2x8xf32>
    %c0_84 = arith.constant 0 : index
    %c0_85 = arith.constant 0 : index
    %169 = vector.load %arg12[%c0_84, %c0_85] : memref<1x1xf32, #tpu.memory_space<vmem>>, vector<1x1xf32>
    %170 = vector.broadcast %169 : vector<1x1xf32> to vector<2x8xf32>
    %171 = arith.addf %168, %170 : vector<2x8xf32>
    %c0_86 = arith.constant 0 : index
    %c0_87 = arith.constant 0 : index
    %172 = vector.load %arg13[%c0_86, %c0_87] : memref<2x8xf32, #tpu.memory_space<vmem>>, vector<2x8xf32>
    tpu.vector_store %arg13[%c0_86, %c0_87], %171 {strides = array<i32>} : memref<2x8xf32, #tpu.memory_space<vmem>>, vector<2x8xf32>,
    %c0_88 = arith.constant 0 : index
    %c0_89 = arith.constant 0 : index
    %173 = vector.load %arg14[%c0_88, %c0_89] : memref<16x4xf32, #tpu.memory_space<vmem>>, vector<16x4xf32>
    tpu.vector_store %arg14[%c0_88, %c0_89], %129 {strides = array<i32>} : memref<16x4xf32, #tpu.memory_space<vmem>>, vector<16x4xf32>,
    return
  }
}

</mosaic_0001>

<bundles_post_ra>
// kernel: tpu_custom_call.1
= control target key start
LH: loop header
LB: loop body
LE: loop exit
PB: predicated region body
PF: predicated region fallthrough
CT: control target
= control target key end

     0   :  { %s4310_s0 = inlined_call_operand.vmem [shape: f32[16,4], index: 0, kind: input, shape index: {}]   ;;  %s4311_s1 = inlined_call_operand.vmem [shape: f32[16,12], index: 1, kind: input, shape index: {}]   ;;  %s4312_s2 = inlined_call_operand.hbm [shape: f32[16,16], index: 2, kind: input, shape index: {}]   ;;  %s4313_s3 = inlined_call_operand.vmem [shape: s32[16,4], index: 3, kind: input, shape index: {}]   ;;  %s4314_s4 = inlined_call_operand.vmem [shape: f32[2,16,16], index: 4, kind: input, shape index: {}]   ;;  %s4315_s5 = inlined_call_operand.hbm [shape: f32[2,16,16], index: 5, kind: input, shape index: {}]   ;;  %s4316_s6 = inlined_call_operand.vmem [shape: f32[2,4,4], index: 6, kind: input, shape index: {}]   ;;  %s4317_s7 = inlined_call_operand.vmem [shape: f32[2,4,4], index: 7, kind: input, shape index: {}]   ;;  %s4318_s8 = inlined_call_operand.vmem [shape: f32[2,1,4], index: 8, kind: input, shape index: {}]   ;;  %s4319_s9 = inlined_call_operand.vmem [shape: f32[2,1,4], index: 9, kind: input, shape index: {}]   ;;  %s4320_s10 = inlined_call_operand.vmem [shape: f32[2,1,4], index: 10, kind: input, shape index: {}]   ;;  %s4321_s11 = inlined_call_operand.vmem [shape: f32[1,4], index: 11, kind: input, shape index: {}]   ;;  %s4322_s12 = inlined_call_operand.<no memory space> [shape: f32[1,1], index: 12, kind: input, shape index: {}]   ;;  %s4323_s13 = inlined_call_operand.hbm [shape: f32[2,8], index: 13, kind: output, shape index: {0}]   ;;  %s4324_s14 = inlined_call_operand.vmem [shape: f32[16,4], index: 14, kind: output, shape index: {1}]  }
   0x1   :  { %v20_v0 = vstv %s4322_s12 }
   0x2   :  { %21 = vst [vmem:[#allocation2] sm:$0x1] %v20_v0 }
   0x3   :  { %22 = vsyncpa [#allocation4], 0 }
   0x4   :  { %23 = vsyncpa [#allocation7], 0 }
   0x5   :  { %24 = vsyncpa [#allocation5], 0  ;;  %s3489_s15 = smov [#allocation3]   ;;  %s3417_s19 = scalar_lea.hbm %s4312_s2, 256 }
   0x6   :  { %s34_s16 = sshll.u32 %s3489_s15, 4  ;;  %p3418_p0 = scmp.ne.s32.totalorder %s4312_s2, %s3417_s19  ;;  %s35_s16 = int_to_ptr.vmem [resolvable:$true] %s34_s16 }
   0x7   :  { %p3421_p1 = scmp.lt.u32.totalorder %s3417_s19, %s4312_s2 }
   0x9   :  { %p3423_p2 = pnand %p3421_p1, %p3418_p0 }
   0xb   :  { %3426 = shalt.err (!%p3423_p2)
}
   0xc   :  { %s3427_s12 = scalar_lea.vmem %s35_s16, 256  ;;  %p3432_p4 = scmp.lt.s32.totalorder %s35_s16, %s35_s16 }
   0xd   :  { %p3428_p3 = scmp.ne.s32.totalorder %s35_s16, %s3427_s12  ;;  %p3433_p5 = scmp.lt.s32.totalorder %s3427_s12, %s3427_s12 }
   0xf   :  { %p3434_p6 = por %p3433_p5, %p3432_p4 }
  0x11   :  { %p3435_p7 = pnand %p3434_p6, %p3428_p3 }
  0x13   :  { %3438 = shalt.err (!%p3435_p7)
}
  0x14   :  { %s3490_s24 = smov 128   ;;  %s3491_s25 = smov 8  }
  0x15   :  { %40 = dma.hbm_to_vmem [thread:$0]  %s4312_s2, 256, %s35_s16, [#allocation4], %s3490_s24, %s3490_s24, %s3491_s25  }
  0x16   :  { %s3492_s28 = smov [#allocation6]   ;;  %s3439_s17 = scalar_lea.hbm %s4315_s5, 512 }
  0x17   :  { %s50_s29 = sshll.u32 %s3492_s28, 4  ;;  %p3440_p8 = scmp.ne.s32.totalorder %s4315_s5, %s3439_s17  ;;  %s51_s29 = int_to_ptr.vmem [resolvable:$true] %s50_s29 }
  0x18   :  { %p3443_p9 = scmp.lt.u32.totalorder %s3439_s17, %s4315_s5 }
  0x1a   :  { %p3445_p10 = pnand %p3443_p9, %p3440_p8 }
  0x1c   :  { %3448 = shalt.err (!%p3445_p10)
}
  0x1d   :  { %s3449_s22 = scalar_lea.vmem %s51_s29, 512  ;;  %p3454_p12 = scmp.lt.s32.totalorder %s51_s29, %s51_s29 }
  0x1e   :  { %p3450_p11 = scmp.ne.s32.totalorder %s51_s29, %s3449_s22  ;;  %p3455_p13 = scmp.lt.s32.totalorder %s3449_s22, %s3449_s22 }
  0x20   :  { %p3456_p0 = por %p3455_p13, %p3454_p12 }
  0x22   :  { %p3457_p1 = pnand %p3456_p0, %p3450_p11 }
  0x24   :  { %3460 = shalt.err (!%p3457_p1)
}
  0x25   :  { %56 = dma.hbm_to_vmem [thread:$0]  %s4315_s5, 512, %s51_s29, [#allocation7], %s3490_s24, %s3490_s24, %s3491_s25  }
  0x26   :  { %3483 = dma.done.wait [#allocation4], 256  }
  0x27   :  { %3484 = vsyncadd [#allocation4], 4294967040 }
  0x28   :  { %3485 = dma.done.wait [#allocation7], 512  }
  0x29   :  { %3486 = vsyncadd [#allocation7], 4294966784  ;;  %vm265_vm0 = vcmask 97280   ;;  %v249_v1 = vld [vmem:[%s4314_s4] sm:$0xff]  ;;  %v250_v2 = vld [vmem:[%s4314_s4 + $0x8] sm:$0xff]  ;;  %vm260_vm1 = vcmask 1043456   ;;  %v85_v19 = vlaneseq }
  0x2a   :  { %v79_v3 = vld [vmem:[%s4311_s1] sm:$0xff]  ;;  %vm433_vm2 = vcmask 130048   ;;  %v261_v4 = vrot.slane %v249_v1, 4  ;;  %v262_v5 = vrot.slane %v250_v2, 4  ;;  %v251_v6 = vld [vmem:[#allocation6] sm:$0xff]  ;;  %vm3493_vm3 = vmmov 1  }
  0x2b   :  { %3258 = vmatprep.mubr.msk.f32.mxu0 %vm265_vm0, %v79_v3  ;;  %v252_v7 = vld [vmem:[#allocation6 + $0x8] sm:$0xff]  ;;  %v81_v9 = vld [vmem:[#allocation3] sm:$0xff]  ;;  %vm3613_vm4 = vmpackc.low %vm260_vm1, %vm3493_vm3  ;;  %vm349_vm5 = vcmask 31744   ;;  %v4325_v18 = vmov 0.0   ;;  %vm3495_vm6 = vmmov 0   ;;  %v3654_v20 = vshrl.u32 %v85_v19, 7 }
  0x2c   :  { %v3358_v8 = vpack.c.bf16 %v252_v7, %v251_v6  ;;  %v263_v10 = vsel %vm260_vm1, %v261_v4, %v262_v5  ;;  %3270 = vmatprep.mubr.msk.f32.mxu1 %vm433_vm2, %v81_v9  ;;  %v253_v12 = vld [vmem:[%s4316_s6] sm:$0xf]  ;;  %v82_v14 = vld [vmem:[#allocation3 + $0x8] sm:$0xff]  ;;  %v3496_v57 = vmov 1966171168   ;;  %v3740_v0 = vand.u32 127, %v85_v19 }
  0x2d   :  { %v3352_v13 = vpack.c.bf16 %v262_v5, %v263_v10  ;;  %v80_v15 = vld [vmem:[%s4311_s1 + $0x8] sm:$0xff]  ;;  %v77_v16 = vld [vmem:[%s4310_s0] sm:$0xff]  ;;  %v3662_v22 = vsub.s32 0, %v3654_v20  ;;  %v3665_v23 = vsub.s32 2, %v3654_v20  ;;  %v3668_v24 = vsub.s32 1, %v3654_v20 }
  0x2e   :  { %3359 = vmatprep.subr.bf16.mxu1 %v3358_v8  ;;  %v3643_v17 = vld [vmem:[%s4310_s0 + $0x8] sm:$0xff]  ;;  %v3659_v21 = vld [vmem:[%s4313_s3] sm:$0xff]  ;;  %v3684_v30 = vsub.s32 3, %v3654_v20  ;;  %v3691_v33 = vsub.s32 4, %v3654_v20  ;;  %v3698_v36 = vsub.s32 5, %v3654_v20  ;;  %v3705_v39 = vsub.s32 6, %v3654_v20 }
  0x2f   :  { %3361 = vmatpush3.bf16.msra.mxu1 %v3358_v8  ;;  %3354 = vmatprep.subr.msk.bf16.mxu0 %vm3613_vm4, %v3352_v13  ;;  %v3673_v25 = vld [vmem:[%s4313_s3 + $0x8] sm:$0xff]  ;;  %v90_v26 = vrot.slane %v3659_v21, %v3662_v22  ;;  %v104_v27 = vrot.slane %v3659_v21, %v3665_v23  ;;  %v97_v28 = vrot.slane %v3659_v21, %v3668_v24  ;;  %v3712_v42 = vsub.s32 7, %v3654_v20 }
  0x30   :  { %3273 = vmatprep.subr.msk.mxu1 %vm260_vm1, %v253_v12  ;;  %3357 = vmatpush3.bf16.msk.msra.mxu0 %vm3613_vm4, %v3352_v13  ;;  %v146_v29 = vrot.slane %v3673_v25, %v3662_v22  ;;  %v153_v31 = vrot.slane %v3673_v25, %v3668_v24  ;;  %v111_v32 = vrot.slane %v3659_v21, %v3684_v30  ;;  %v753_v58 = vunpack.c.l.s4 %v3496_v57  ;;  %v3416_v11 = vld [vmem:[#allocation3 + $0x8] sm:$0xff] }
  0x31   :  { %3261 = vmatprep.subr.msk.mxu0 %vm260_vm1, %v249_v1  ;;  %92 = vbcast.lane.b32.xlu0 %v90_v26, 256  ;;  %4338 = vst [vmem:[#allocation12_spill] sm:$0xff] %v3691_v33  ;;  %v160_v34 = vrot.slane %v3673_v25, %v3665_v23  ;;  %v118_v35 = vrot.slane %v3659_v21, %v3691_v33  ;;  %4339 = vst [vmem:[#allocation13_spill] sm:$0xff] %v3698_v36  ;;  %vm945_vm13 = vcmask 60416  }
  0x32   :  { %3271 = vmatmul.mubr.msk.f32.vlgmr.msra.gmra.mrb[0].mxu1 %vm433_vm2, %v82_v14  ;;  %106 = vbcast.lane.b32.xlu1 %v104_v27, 256  ;;  %v167_v37 = vrot.slane %v3673_v25, %v3684_v30  ;;  %v125_v38 = vrot.slane %v3659_v21, %v3698_v36  ;;  %4340 = vst [vmem:[#allocation14_spill] sm:$0xff] %v3705_v39  ;;  %4341 = vst [vmem:[#allocation15_spill] sm:$0xff] %v3712_v42  ;;  %v754_v60 = vunpack.c.0.s8 %v753_v58 }
  0x33   :  { %3274 = vmatpush3.msk.msra.mxu1 %vm260_vm1, %v253_v12  ;;  %3275 = vmatprep.mubr.msk.f32.mxu1 %vm349_vm5, %v81_v9  ;;  %v174_v40 = vrot.slane %v3673_v25, %v3691_v33  ;;  %v132_v41 = vrot.slane %v3659_v21, %v3705_v39  ;;  %v181_v43 = vrot.slane %v3673_v25, %v3698_v36 }
  0x34   :  { %3259 = vmatmul.mubr.msk.f32.vlgmr.msra.gmra.mrb[0].mxu0 %vm265_vm0, %v80_v15  ;;  %3283 = vmatprep.subr.mxu1 %v4325_v18  ;;  %v139_v44 = vrot.slane %v3659_v21, %v3712_v42  ;;  %v188_v45 = vrot.slane %v3673_v25, %v3705_v39  ;;  %v195_v46 = vrot.slane %v3673_v25, %v3712_v42 }
  0x35   :  { %3262 = vmatpush3.msk.msra.mxu0 %vm260_vm1, %v249_v1  ;;  %3263 = vmatprep.mubr.msk.f32.mxu0 %vm349_vm5, %v77_v16  ;;  %v3735_v62 = vsub.s32 %v754_v60, %v3654_v20 }
  0x36   :  { %3276 = vmatmul.mubr.msk.f32.vlgmr.msra.gmra.mrb[2].mxu1 %vm349_vm5, %v82_v14  ;;  %3278 = vmatprep.subr.mxu0 %v4325_v18 }
  0x37   :  { %3285 = vmatprep.mubr.msk.f32.mxu1 %vm3495_vm6, %v4325_v18  ;;  %99 = vbcast.lane.b32.xlu0 %v97_v28, 256 }
  0x38   :  { %148 = vbcast.lane.b32.xlu1 %v146_v29, 256 }
  0x3b   :  { %155 = vbcast.lane.b32.xlu0 %v153_v31, 256 }
  0x3c   :  { %3264 = vmatmul.mubr.msk.f32.vlgmr.msra.gmra.mrb[0].mxu0 %vm349_vm5, %v3643_v17  ;;  %113 = vbcast.lane.b32.xlu1 %v111_v32, 256 }
  0x3d   :  { %3280 = vmatprep.mubr.msk.f32.mxu0 %vm3495_vm6, %v4325_v18 }
  0x3f   :  { %162 = vbcast.lane.b32.xlu0 %v160_v34, 256 }
  0x40   :  { %120 = vbcast.lane.b32.xlu1 %v118_v35, 256 }
  0x43   :  { %169 = vbcast.lane.b32.xlu0 %v167_v37, 256 }
  0x44   :  { %127 = vbcast.lane.b32.xlu1 %v125_v38, 256 }
  0x47   :  { %176 = vbcast.lane.b32.xlu0 %v174_v40, 256 }
  0x48   :  { %134 = vbcast.lane.b32.xlu1 %v132_v41, 256 }
  0x4b   :  { %183 = vbcast.lane.b32.xlu0 %v181_v43, 256 }
  0x4c   :  { %141 = vbcast.lane.b32.xlu1 %v139_v44, 256 }
  0x4f   :  { %190 = vbcast.lane.b32.xlu0 %v188_v45, 256 }
  0x50   :  { %197 = vbcast.lane.b32.xlu1 %v195_v46, 256 }
  0xa3   :  { %v93_v53 = vpop.permute.xlu0 %92 }
  0xa4   :  { %v107_v56 = vpop.permute.xlu1 %106  ;;  %vm199_vm9 = vcmp.eq.s32.totalorder %v93_v53, %v3740_v0 }
  0xa5   :  { %v3775_v41 = vsel %vm199_vm9, 1.0, %v4325_v18  ;;  %vm201_vm12 = vcmp.eq.s32.totalorder %v107_v56, %v3740_v0 }
  0xa6   :  { %v3801_v56 = vsel %vm201_vm12, 1.0, %v4325_v18 }
  0xa9   :  { %v3732_v54 = vpop.permute.xlu0 %99 }
  0xaa   :  { %v149_v61 = vpop.permute.xlu1 %148  ;;  %vm200_vm15 = vcmp.eq.s32.totalorder %v3732_v54, %v3740_v0 }
  0xab   :  { %vm207_vm7 = vcmp.eq.s32.totalorder %v149_v61, %v3740_v0 }
  0xac   :  { %v3754_v14 = vsel %vm207_vm7, 1.0, %v4325_v18 }
  0xad   :  { %v156_v55 = vpop.permute.xlu0 %155 }
  0xae   :  { %v3742_v1 = vpop.permute.xlu1 %113  ;;  %vm208_vm8 = vcmp.eq.s32.totalorder %v156_v55, %v3740_v0 }
  0xaf   :  { %v3757_v15 = vsel %vm208_vm8, 1.0, %v4325_v18  ;;  %vm202_vm3 = vcmp.eq.s32.totalorder %v3742_v1, %v3740_v0 }
  0xb1   :  { %v163_v59 = vpop.permute.xlu0 %162 }
  0xb2   :  { %vm209_vm10 = vcmp.eq.s32.totalorder %v163_v59, %v3740_v0  ;;  %v121_v28 = vpop.permute.xlu1 %120 }
  0xb3   :  { %v3779_v43 = vsel %vm209_vm10, 1.0, %v4325_v18  ;;  %vm203_vm14 = vcmp.eq.s32.totalorder %v121_v28, %v3740_v0 }
  0xb4   :  { %v3808_v59 = vsel %vm203_vm14, 1.0, %v4325_v18 }
  0xb5   :  { %v3737_v63 = vpop.permute.xlu0 %169 }
  0xb6   :  { %v128_v57 = vpop.permute.xlu1 %127  ;;  %vm210_vm7 = vcmp.eq.s32.totalorder %v3737_v63, %v3740_v0  ;;  %v3835_v63 = vsel %vm202_vm3, 1.0, %v4325_v18  ;;  %vm1076_vm3 = vcmask 1042434  }
  0xb7   :  { %vm204_vm8 = vcmp.eq.s32.totalorder %v128_v57, %v3740_v0 }
  0xb9   :  { %v177_v16 = vpop.permute.xlu0 %176 }
  0xba   :  { %vm211_vm11 = vcmp.eq.s32.totalorder %v177_v16, %v3740_v0 }
  0xbb   :  { %v3785_v44 = vsel %vm211_vm11, 1.0, %v4325_v18 }
  0xbd   :  { %v184_v58 = vpop.permute.xlu0 %183 }
  0xbe   :  { %vm212_vm10 = vcmp.eq.s32.totalorder %v184_v58, %v3740_v0 }
 0x105   :  { %v3272_v47 = vpop.f32.mrb[0].mxu1 }
 0x106   :  { %v506_v48 = vpop.f32.mrb[1].mxu1  ;;  %3284 = vmatpush3.xpose.msk.msra.mxu1 %vm433_vm2, %v3272_v47 }
 0x107   :  { %3279 = vmatpush3.xpose.msk.msra.mxu0 %vm433_vm2, %v506_v48  ;;  %3293 = vmatprep.subr.mxu1 %v4325_v18 }
 0x108   :  { %3288 = vmatprep.subr.mxu0 %v4325_v18 }
 0x109   :  { %v3277_v49 = vpop.f32.mrb[2].mxu1 }
 0x10a   :  { %v588_v50 = vpop.f32.mrb[3].mxu1 }
 0x10f   :  { %v3265_v51 = vpop.f32.mrb[0].mxu0 }
 0x110   :  { %v424_v52 = vpop.f32.mrb[1].mxu0  ;;  %3286 = vmatmul.mubr.msk.f32.vlgmr.msra.gmra.mrb[4].mxu1 %vm433_vm2, %v3265_v51 }
 0x111   :  { %3281 = vmatmul.mubr.msk.f32.vlgmr.msra.gmra.mrb[2].mxu0 %vm433_vm2, %v424_v52  ;;  %3294 = vmatpush3.msra.mxu1 %v3277_v49 }
 0x112   :  { %3289 = vmatpush3.msra.mxu0 %v588_v50  ;;  %3290 = vmatprep.mubr.msk.f32.mxu0 %vm3495_vm6, %v4325_v18 }
 0x113   :  { %3295 = vmatprep.mubr.msk.f32.mxu1 %vm3495_vm6, %v4325_v18 }
 0x1e3   :  { %v745_v2 = vpop.f32.mrb[4].mxu1 }
 0x1e4   :  { %v800_v3 = vcombine.high %v745_v2, %v745_v2  ;;  %v807_v4 = vrot.slane %v745_v2, %v3735_v62  ;;  %v669_v5 = vpop.f32.mrb[2].mxu0  ;;  %v3287_v6 = vpop.f32.mrb[5].mxu1 }
 0x1e5   :  { %v751_v7 = vcombine.high %v669_v5, %v669_v5  ;;  %v758_v8 = vrot.slane %v669_v5, %v3735_v62  ;;  %v3282_v9 = vpop.f32.mrb[3].mxu0 }
 0x1e6   :  { %v3749_v10 = vrot.slane %v800_v3, %v3735_v62  ;;  %v815_v12 = vcombine.high %v807_v4, %v807_v4  ;;  %v823_v13 = vrot.slane %v807_v4, %v3735_v62  ;;  %v3820_v9 = vsel %vm200_vm15, 1.0, %v4325_v18 }
 0x1e7   :  { %v774_v19 = vrot.slane %v758_v8, %v3735_v62  ;;  %v765_v31 = vrot.slane %v751_v7, %v3735_v62  ;;  %v766_v32 = vcombine.high %v758_v8, %v758_v8  ;;  %vm1074_vm15 = vcmask 1041409  }
 0x1e8   :  { %v837_v26 = vrot.slane %v815_v12, %v3735_v62  ;;  %v845_v27 = vcombine.high %v823_v13, %v823_v13  ;;  %v3765_v29 = vrot.slane %v3749_v10, %v3735_v62  ;;  %v884_v35 = vrot.slane %v823_v13, %v3662_v22  ;;  %v191_v12 = vpop.permute.xlu0 %190 }
 0x1e9   :  { %v796_v34 = vcombine.high %v774_v19, %v774_v19  ;;  %v852_v38 = vrot.slane %v774_v19, %v3662_v22  ;;  %v3790_v47 = vrot.slane %v765_v31, %v3735_v62  ;;  %v788_v48 = vrot.slane %v766_v32, %v3735_v62 }
 0x1ea   :  { %v888_v37 = vrot.slane %v837_v26, %v3662_v22  ;;  %v892_v40 = vrot.slane %v845_v27, %v3662_v22  ;;  %v937_v45 = vmul.f32 %v3754_v14, %v884_v35  ;;  %v900_v50 = vrot.slane %v3765_v29, %v3662_v22 }
 0x1eb   :  { %v860_v49 = vrot.slane %v796_v34, %v3662_v22  ;;  %v929_v53 = vmul.f32 %v3775_v41, %v852_v38  ;;  %v816_v60 = vcombine.high %v3749_v10, %v3749_v10  ;;  %v767_v61 = vcombine.high %v765_v31, %v765_v31  ;;  %v135_v10 = vpop.permute.xlu1 %134 }
 0x1ec   :  { %v938_v46 = vmul.f32 %v3757_v15, %v888_v37  ;;  %v970_v51 = vsel %vm945_vm13, %v937_v45, 0.0  ;;  %v939_v55 = vmul.f32 %v3779_v43, %v892_v40  ;;  %v941_v3 = vmul.f32 %v3785_v44, %v900_v50 }
 0x1ed   :  { %971 = vadd.xlane.f32.xlu0 %v970_v51  ;;  %v931_v2 = vmul.f32 %v3801_v56, %v860_v49  ;;  %v868_v4 = vrot.slane %v3790_v47, %v3662_v22  ;;  %v856_v5 = vrot.slane %v788_v48, %v3662_v22  ;;  %v946_v54 = vsel %vm945_vm13, %v929_v53, 0.0 }
 0x1ee   :  { %v973_v52 = vsel %vm945_vm13, %v938_v46, 0.0  ;;  %v976_v6 = vsel %vm945_vm13, %v939_v55, 0.0  ;;  %v798_v7 = vcombine.high %v788_v48, %v788_v48  ;;  %v847_v8 = vcombine.high %v837_v26, %v837_v26 }
 0x1ef   :  { %974 = vadd.xlane.f32.xlu1 %v973_v52  ;;  %v952_v13 = vsel %vm945_vm13, %v931_v2, 0.0  ;;  %v982_v16 = vsel %vm945_vm13, %v941_v3, 0.0  ;;  %v933_v19 = vmul.f32 %v3808_v59, %v868_v4  ;;  %v930_v26 = vmul.f32 %v3820_v9, %v856_v5  ;;  %v142_v51 = vpop.permute.xlu1 %141 }
 0x1f0   :  { %v864_v27 = vrot.slane %v798_v7, %v3662_v22  ;;  %v896_v28 = vrot.slane %v847_v8, %v3662_v22  ;;  %v795_v31 = vrot.slane %v767_v61, %v3735_v62  ;;  %v844_v1 = vrot.slane %v816_v60, %v3735_v62 }
 0x1f1   :  { %947 = vadd.xlane.f32.xlu0 %v946_v54  ;;  %v3838_v32 = vsel %vm210_vm7, 1.0, %v4325_v18  ;;  %vm205_vm9 = vcmp.eq.s32.totalorder %v135_v10, %v3740_v0  ;;  %vm213_vm11 = vcmp.eq.s32.totalorder %v191_v12, %v3740_v0  ;;  %v958_v34 = vsel %vm945_vm13, %v933_v19, 0.0 }
 0x1f2   :  { %v949_v35 = vsel %vm945_vm13, %v930_v26, 0.0  ;;  %v797_v37 = vcombine.high %v3790_v47, %v3790_v47  ;;  %v846_v38 = vcombine.high %v3765_v29, %v3765_v29  ;;  %v932_v40 = vmul.f32 %v3835_v63, %v864_v27 }
 0x1f3   :  { %977 = vadd.xlane.f32.xlu1 %v976_v6  ;;  %v940_v45 = vmul.f32 %v3838_v32, %v896_v28  ;;  %v872_v46 = vrot.slane %v795_v31, %v3662_v22  ;;  %v904_v48 = vrot.slane %v844_v1, %v3662_v22  ;;  %v3855_v49 = vsel %vm204_vm8, 1.0, %v4325_v18  ;;  %v198_v2 = vpop.permute.xlu1 %197 }
 0x1f4   :  { %v3858_v50 = vsel %vm212_vm10, 1.0, %v4325_v18  ;;  %v3863_v29 = vsel %vm205_vm9, 1.0, %v4325_v18  ;;  %v3866_v47 = vsel %vm213_vm11, 1.0, %v4325_v18  ;;  %v876_v52 = vrot.slane %v797_v37, %v3662_v22 }
 0x1f5   :  { %953 = vadd.xlane.f32.xlu0 %v952_v13  ;;  %v908_v53 = vrot.slane %v846_v38, %v3662_v22  ;;  %v799_v55 = vcombine.high %v795_v31, %v795_v31  ;;  %v955_v57 = vsel %vm945_vm13, %v932_v40, 0.0  ;;  %v979_v58 = vsel %vm945_vm13, %v940_v45, 0.0 }
 0x1f6   :  { %v934_v60 = vmul.f32 %v3855_v49, %v872_v46  ;;  %v942_v61 = vmul.f32 %v3858_v50, %v904_v48  ;;  %vm206_vm12 = vcmp.eq.s32.totalorder %v142_v51, %v3740_v0  ;;  %v935_v3 = vmul.f32 %v3863_v29, %v876_v52 }
 0x1f7   :  { %983 = vadd.xlane.f32.xlu1 %v982_v16  ;;  %v943_v4 = vmul.f32 %v3866_v47, %v908_v53  ;;  %v880_v6 = vrot.slane %v799_v55, %v3662_v22  ;;  %v848_v7 = vcombine.high %v844_v1, %v844_v1  ;;  %v3881_v8 = vsel %vm206_vm12, 1.0, %v4325_v18 }
 0x1f8   :  { %v961_v5 = vsel %vm945_vm13, %v934_v60, 0.0  ;;  %v985_v54 = vsel %vm945_vm13, %v942_v61, 0.0  ;;  %vm214_vm14 = vcmp.eq.s32.totalorder %v198_v2, %v3740_v0  ;;  %v964_v10 = vsel %vm945_vm13, %v935_v3, 0.0 }
 0x1f9   :  { %959 = vadd.xlane.f32.xlu0 %v958_v34  ;;  %v988_v12 = vsel %vm945_vm13, %v943_v4, 0.0  ;;  %v936_v13 = vmul.f32 %v3881_v8, %v880_v6  ;;  %v912_v16 = vrot.slane %v848_v7, %v3662_v22  ;;  %v3889_v19 = vsel %vm214_vm14, 1.0, %v4325_v18 }
 0x1fa   :  { %v3896_v46 = vsub.s32 %v3740_v0, %v3654_v20  ;;  %vm1078_vm7 = vcmask 1043459   ;;  %vm1080_vm8 = vcmask 1044484   ;;  %vm1082_vm9 = vcmask 1045509  }
 0x1fb   :  { %950 = vadd.xlane.f32.xlu1 %v949_v35  ;;  %v967_v26 = vsel %vm945_vm13, %v936_v13, 0.0  ;;  %v944_v27 = vmul.f32 %v3889_v19, %v912_v16  ;;  %vm1084_vm10 = vcmask 1046534   ;;  %vm247_vm11 = vcmp.eq.s32.totalorder %v3659_v21, 8 }
 0x1fc   :  { %vm1086_vm12 = vcmask 1047559   ;;  %vm4335_vm14 = vcmp.eq.s32.totalorder %v3673_v25, 8 }
 0x1fd   :  { %956 = vadd.xlane.f32.xlu0 %v955_v57  ;;  %v991_v28 = vsel %vm945_vm13, %v944_v27, 0.0 }
 0x1ff   :  { %980 = vadd.xlane.f32.xlu1 %v979_v58 }
 0x201   :  { %962 = vadd.xlane.f32.xlu0 %v961_v5 }
 0x203   :  { %986 = vadd.xlane.f32.xlu1 %v985_v54 }
 0x205   :  { %965 = vadd.xlane.f32.xlu0 %v964_v10 }
 0x207   :  { %989 = vadd.xlane.f32.xlu1 %v988_v12 }
 0x209   :  { %968 = vadd.xlane.f32.xlu0 %v967_v26 }
 0x20d   :  { %992 = vadd.xlane.f32.xlu0 %v991_v28 }
 0x27a   :  { %v972_v31 = vpop.xlane.xlu0 %971 }
 0x27b   :  { %v1045_v4 = vrot.slane %v972_v31, %v3896_v46 }
 0x27c   :  { %v975_v1 = vpop.xlane.xlu1 %974 }
 0x27d   :  { %v1049_v20 = vrot.slane %v975_v1, %v3896_v46 }
 0x27e   :  { %v948_v34 = vpop.xlane.xlu0 %947 }
 0x27f   :  { %v1013_v53 = vrot.slane %v948_v34, %v3896_v46  ;;  %v1088_v12 = vsel %vm1074_vm15, %v1049_v20, %v1045_v4 }
 0x280   :  { %v978_v35 = vpop.xlane.xlu1 %977 }
 0x281   :  { %v1053_v0 = vrot.slane %v978_v35, %v3896_v46 }
 0x282   :  { %v954_v37 = vpop.xlane.xlu0 %953 }
 0x283   :  { %v1021_v57 = vrot.slane %v954_v37, %v3896_v46  ;;  %v1089_v16 = vsel %vm1076_vm3, %v1053_v0, %v1088_v12 }
 0x284   :  { %v984_v38 = vpop.xlane.xlu1 %983 }
 0x285   :  { %v1061_v35 = vrot.slane %v984_v38, %v3896_v46 }
 0x286   :  { %v960_v40 = vpop.xlane.xlu0 %959 }
 0x287   :  { %v1029_v7 = vrot.slane %v960_v40, %v3896_v46 }
 0x288   :  { %v951_v45 = vpop.xlane.xlu1 %950 }
 0x289   :  { %v1017_v48 = vrot.slane %v951_v45, %v3896_v46 }
 0x28a   :  { %v957_v51 = vpop.xlane.xlu0 %956 }
 0x28b   :  { %v1075_v55 = vsel %vm1074_vm15, %v1017_v48, %v1013_v53  ;;  %v1025_v60 = vrot.slane %v957_v51, %v3896_v46 }
 0x28c   :  { %v981_v52 = vpop.xlane.xlu1 %980  ;;  %v1077_v2 = vsel %vm1076_vm3, %v1021_v57, %v1075_v55 }
 0x28d   :  { %v1079_v5 = vsel %vm1078_vm7, %v1025_v60, %v1077_v2  ;;  %v1057_v54 = vrot.slane %v981_v52, %v3896_v46 }
 0x28e   :  { %v963_v58 = vpop.xlane.xlu0 %962  ;;  %v1081_v26 = vsel %vm1080_vm8, %v1029_v7, %v1079_v5 }
 0x28f   :  { %v1033_v6 = vrot.slane %v963_v58, %v3896_v46  ;;  %v1090_v28 = vsel %vm1078_vm7, %v1057_v54, %v1089_v16 }
 0x290   :  { %v987_v61 = vpop.xlane.xlu1 %986  ;;  %v1091_v48 = vsel %vm1080_vm8, %v1061_v35, %v1090_v28 }
 0x291   :  { %v1083_v31 = vsel %vm1082_vm9, %v1033_v6, %v1081_v26  ;;  %v1065_v1 = vrot.slane %v987_v61, %v3896_v46 }
 0x292   :  { %v966_v3 = vpop.xlane.xlu0 %965 }
 0x293   :  { %v1037_v10 = vrot.slane %v966_v3, %v3896_v46  ;;  %v1092_v53 = vsel %vm1082_vm9, %v1065_v1, %v1091_v48 }
 0x294   :  { %v990_v13 = vpop.xlane.xlu1 %989 }
 0x295   :  { %v1069_v37 = vrot.slane %v990_v13, %v3896_v46  ;;  %v1085_v40 = vsel %vm1084_vm10, %v1037_v10, %v1083_v31 }
 0x296   :  { %v969_v27 = vpop.xlane.xlu0 %968 }
 0x297   :  { %v1041_v34 = vrot.slane %v969_v27, %v3896_v46  ;;  %v1093_v38 = vsel %vm1084_vm10, %v1069_v37, %v1092_v53 }
 0x299   :  { %v1087_v45 = vsel %vm1086_vm12, %v1041_v34, %v1085_v40 }
 0x29a   :  { %v993_v51 = vpop.xlane.xlu0 %992  ;;  %v1097_v52 = vsel %vm247_vm11, -1e+20, %v1087_v45 }
 0x29b   :  { %v1073_v55 = vrot.slane %v993_v51, %v3896_v46  ;;  %v1099_v57 = vsel %vm349_vm5, %v1097_v52, -inf }
 0x29c   :  { %1100 = vmax.xlane.f32.xlu1 %v1099_v57 }
 0x29d   :  { %v1094_v58 = vsel %vm1086_vm12, %v1073_v55, %v1093_v38 }
 0x29e   :  { %v1098_v60 = vsel %vm4335_vm14, -1e+20, %v1094_v58  ;;  %vm1376_vm14 = vcmask 64512  }
 0x29f   :  { %v1102_v61 = vsel %vm349_vm5, %v1098_v60, -inf }
 0x2a0   :  { %1103 = vmax.xlane.f32.xlu0 %v1102_v61 }
 0x329   :  { %v1101_v2 = vpop.xlane.xlu1 %1100 }
 0x32a   :  { %v1105_v20 = vsub.f32 %v1097_v52, %v1101_v2 }
 0x32c   :  { %v1107_v0 = vmul.f32 1.442695, %v1105_v20 }
 0x32d   :  { %v1104_v3 = vpop.xlane.xlu0 %1103 }
 0x32e   :  { %3388 = vpow2.f32 %v1107_v0  ;;  %v1106_v4 = vsub.f32 %v1098_v60, %v1104_v3 }
 0x330   :  { %v1109_v5 = vmul.f32 1.442695, %v1106_v4 }
 0x332   :  { %3390 = vpow2.f32 %v1109_v5 }
 0x338   :  { %v3389_v54 = vpop.eup %3388 }
 0x339   :  { %v1111_v6 = vsel %vm349_vm5, %v3389_v54, 0.0 }
 0x33a   :  { %1112 = vadd.xlane.f32.xlu1 %v1111_v6 }
 0x33c   :  { %v3391_v7 = vpop.eup %3390 }
 0x33d   :  { %v1114_v10 = vsel %vm349_vm5, %v3391_v7, 0.0 }
 0x33e   :  { %1115 = vadd.xlane.f32.xlu0 %v1114_v10 }
 0x3c7   :  { %v1113_v12 = vpop.xlane.xlu1 %1112 }
 0x3c8   :  { %3392 = vrcp.f32 %v1113_v12 }
 0x3cb   :  { %v1116_v13 = vpop.xlane.xlu0 %1115 }
 0x3cc   :  { %3394 = vrcp.f32 %v1116_v13 }
 0x3d2   :  { %v3393_v16 = vpop.eup %3392 }
 0x3d3   :  { %v1118_v28 = vmul.f32 %v3393_v16, %v3389_v54 }
 0x3d5   :  { %v1124_v35 = vrot.slane %v1118_v28, %v3662_v22  ;;  %v1138_v40 = vrot.slane %v1118_v28, %v3665_v23  ;;  %v1145_v48 = vrot.slane %v1118_v28, %v3684_v30  ;;  %v1131_v51 = vrot.slane %v1118_v28, %v3668_v24 }
 0x3d6   :  { %v3395_v26 = vpop.eup %3394  ;;  %v1152_v52 = vrot.slane %v1118_v28, %v3691_v33  ;;  %v1159_v55 = vrot.slane %v1118_v28, %v3698_v36  ;;  %v1166_v38 = vrot.slane %v1118_v28, %v3705_v39  ;;  %v1173_v58 = vrot.slane %v1118_v28, %v3712_v42 }
 0x3d7   :  { %v1120_v27 = vmul.f32 %v3395_v26, %v3391_v7 }
 0x3d9   :  { %v1187_v31 = vrot.slane %v1120_v27, %v3668_v24  ;;  %v1180_v1 = vrot.slane %v1120_v27, %v3662_v22  ;;  %v1194_v34 = vrot.slane %v1120_v27, %v3665_v23  ;;  %v1201_v37 = vrot.slane %v1120_v27, %v3684_v30 }
 0x3da   :  { %v1208_v45 = vrot.slane %v1120_v27, %v3691_v33  ;;  %v1215_v53 = vrot.slane %v1120_v27, %v3698_v36  ;;  %v1222_v57 = vrot.slane %v1120_v27, %v3705_v39  ;;  %v1229_v60 = vrot.slane %v1120_v27, %v3712_v42 }
 0x3db   :  { %1189 = vbcast.lane.b32.xlu0 %v1187_v31, 256  ;;  %1182 = vbcast.lane.b32.xlu1 %v1180_v1, 256 }
 0x3df   :  { %1196 = vbcast.lane.b32.xlu0 %v1194_v34, 256  ;;  %1126 = vbcast.lane.b32.xlu1 %v1124_v35, 256 }
 0x3e3   :  { %1203 = vbcast.lane.b32.xlu0 %v1201_v37, 256  ;;  %1140 = vbcast.lane.b32.xlu1 %v1138_v40, 256 }
 0x3e7   :  { %1210 = vbcast.lane.b32.xlu0 %v1208_v45, 256  ;;  %1147 = vbcast.lane.b32.xlu1 %v1145_v48, 256 }
 0x3eb   :  { %1133 = vbcast.lane.b32.xlu0 %v1131_v51, 256  ;;  %1154 = vbcast.lane.b32.xlu1 %v1152_v52, 256 }
 0x3ef   :  { %1217 = vbcast.lane.b32.xlu0 %v1215_v53, 256  ;;  %1161 = vbcast.lane.b32.xlu1 %v1159_v55, 256 }
 0x3f3   :  { %1224 = vbcast.lane.b32.xlu0 %v1222_v57, 256  ;;  %1168 = vbcast.lane.b32.xlu1 %v1166_v38, 256 }
 0x3f7   :  { %1175 = vbcast.lane.b32.xlu1 %v1173_v58, 256 }
 0x3fb   :  { %1231 = vbcast.lane.b32.xlu1 %v1229_v60, 256 }
 0x44d   :  { %v1190_v61 = vpop.permute.xlu0 %1189  ;;  %v1183_v2 = vpop.permute.xlu1 %1182 }
 0x44e   :  { %v1242_v20 = vmul.f32 %v3757_v15, %v1190_v61  ;;  %v1241_v0 = vmul.f32 %v3754_v14, %v1183_v2 }
 0x450   :  { %v1312_v3 = vsel %vm945_vm13, %v1242_v20, 0.0  ;;  %v1305_v4 = vsel %vm945_vm13, %v1241_v0, 0.0 }
 0x451   :  { %v1313_v5 = vrot.slane %v1312_v3, 4  ;;  %v1197_v54 = vpop.permute.xlu0 %1196  ;;  %v1127_v6 = vpop.permute.xlu1 %1126  ;;  %v1306_v7 = vrot.slane %v1305_v4, 4 }
 0x452   :  { %v1233_v10 = vmul.f32 %v3775_v41, %v1127_v6  ;;  %v1243_v12 = vmul.f32 %v3779_v43, %v1197_v54 }
 0x453   :  { %v1314_v13 = vadd.f32 %v1313_v5, %v1312_v3  ;;  %v1307_v31 = vadd.f32 %v1306_v7, %v1305_v4 }
 0x454   :  { %v1249_v16 = vsel %vm945_vm13, %v1233_v10, 0.0  ;;  %v1319_v34 = vsel %vm945_vm13, %v1243_v12, 0.0 }
 0x455   :  { %v1250_v26 = vrot.slane %v1249_v16, 4  ;;  %v1204_v27 = vpop.permute.xlu0 %1203  ;;  %v1141_v28 = vpop.permute.xlu1 %1140  ;;  %v1315_v35 = vrot.slane %v1314_v13, 2  ;;  %v1308_v52 = vrot.slane %v1307_v31, 2  ;;  %v1320_v53 = vrot.slane %v1319_v34, 4 }
 0x456   :  { %v1235_v1 = vmul.f32 %v3801_v56, %v1141_v28  ;;  %v1244_v37 = vmul.f32 %v3838_v32, %v1204_v27 }
 0x457   :  { %v1251_v45 = vadd.f32 %v1250_v26, %v1249_v16  ;;  %v1316_v58 = vadd.f32 %v1315_v35, %v1314_v13  ;;  %v3969_v4 = vadd.f32 %v1308_v52, %v1307_v31  ;;  %v1321_v5 = vadd.f32 %v1320_v53, %v1319_v34 }
 0x458   :  { %v1263_v40 = vsel %vm945_vm13, %v1235_v1, 0.0  ;;  %v1326_v60 = vsel %vm945_vm13, %v1244_v37, 0.0 }
 0x459   :  { %v1211_v48 = vpop.permute.xlu0 %1210  ;;  %v1148_v51 = vpop.permute.xlu1 %1147  ;;  %v1264_v55 = vrot.slane %v1263_v40, 4  ;;  %v1252_v20 = vrot.slane %v1251_v45, 2  ;;  %v1327_v7 = vrot.slane %v1326_v60, 4  ;;  %v1317_v13 = vrot.slane %v1316_v58, 1 }
 0x45a   :  { %v1236_v57 = vmul.f32 %v3835_v63, %v1148_v51  ;;  %v1245_v38 = vmul.f32 %v3785_v44, %v1211_v48 }
 0x45b   :  { %v1265_v61 = vadd.f32 %v1264_v55, %v1263_v40  ;;  %v1253_v28 = vadd.f32 %v1252_v20, %v1251_v45  ;;  %v1322_v40 = vrot.slane %v1321_v5, 2  ;;  %v1328_v52 = vadd.f32 %v1327_v7, %v1326_v60 }
 0x45c   :  { %v1270_v2 = vsel %vm945_vm13, %v1236_v57, 0.0  ;;  %v1333_v10 = vsel %vm945_vm13, %v1245_v38, 0.0  ;;  %v3979_v38 = vadd.f32 %v1317_v13, %v1316_v58 }
 0x45d   :  { %v1134_v0 = vpop.permute.xlu0 %1133  ;;  %v1155_v3 = vpop.permute.xlu1 %1154  ;;  %v1271_v54 = vrot.slane %v1270_v2, 4  ;;  %v1266_v16 = vrot.slane %v1265_v61, 2  ;;  %v1334_v48 = vrot.slane %v1333_v10, 4  ;;  %v1323_v34 = vadd.f32 %v1322_v40, %v1321_v5 }
 0x45e   :  { %v1234_v6 = vmul.f32 %v3820_v9, %v1134_v0  ;;  %v1237_v12 = vmul.f32 %v3808_v59, %v1155_v3  ;;  %v1254_v0 = vrot.slane %v1253_v28, 1 }
 0x45f   :  { %v1272_v26 = vadd.f32 %v1271_v54, %v1270_v2  ;;  %v1267_v2 = vadd.f32 %v1266_v16, %v1265_v61  ;;  %v1335_v60 = vadd.f32 %v1334_v48, %v1333_v10 }
 0x460   :  { %v1256_v27 = vsel %vm945_vm13, %v1234_v6, 0.0  ;;  %v1277_v35 = vsel %vm945_vm13, %v1237_v12, 0.0 }
 0x461   :  { %v1257_v1 = vrot.slane %v1256_v27, 4  ;;  %v1218_v31 = vpop.permute.xlu0 %1217  ;;  %v1162_v37 = vpop.permute.xlu1 %1161  ;;  %v1278_v51 = vrot.slane %v1277_v35, 4  ;;  %v1273_v45 = vrot.slane %v1272_v26, 2  ;;  %v1268_v61 = vrot.slane %v1267_v2, 1 }
 0x462   :  { %v1246_v55 = vmul.f32 %v3858_v50, %v1218_v31  ;;  %v1238_v57 = vmul.f32 %v3855_v49, %v1162_v37  ;;  %v1336_v5 = vrot.slane %v1335_v60, 2 }
 0x463   :  { %v1258_v53 = vadd.f32 %v1257_v1, %v1256_v27  ;;  %v1279_v20 = vadd.f32 %v1278_v51, %v1277_v35  ;;  %v1329_v1 = vrot.slane %v1328_v52, 2  ;;  %v1274_v13 = vadd.f32 %v1273_v45, %v1272_v26 }
 0x464   :  { %v1340_v54 = vsel %vm945_vm13, %v1246_v55, 0.0  ;;  %v1284_v6 = vsel %vm945_vm13, %v1238_v57, 0.0  ;;  %v1255_v51 = vadd.f32 %v1254_v0, %v1253_v28  ;;  %v1269_v26 = vadd.f32 %v1268_v61, %v1267_v2 }
 0x465   :  { %v1259_v3 = vrot.slane %v1258_v53, 2  ;;  %v1225_v12 = vpop.permute.xlu0 %1224  ;;  %v1169_v18 = vpop.permute.xlu1 %1168  ;;  %v1280_v7 = vrot.slane %v1279_v20, 2  ;;  %v1341_v27 = vrot.slane %v1340_v54, 4  ;;  %v1285_v37 = vrot.slane %v1284_v6, 4 }
 0x466   :  { %v1247_v58 = vmul.f32 %v3866_v47, %v1225_v12  ;;  %v1239_v35 = vmul.f32 %v3863_v29, %v1169_v18  ;;  %v1275_v45 = vrot.slane %v1274_v13, 1 }
 0x467   :  { %v1260_v31 = vadd.f32 %v1259_v3, %v1258_v53  ;;  %v1342_v16 = vadd.f32 %v1341_v27, %v1340_v54  ;;  %v1286_v42 = vadd.f32 %v1285_v37, %v1284_v6  ;;  %v1281_v10 = vadd.f32 %v1280_v7, %v1279_v20 }
 0x468   :  { %v1347_v57 = vsel %vm945_vm13, %v1247_v58, 0.0  ;;  %v1291_v48 = vsel %vm945_vm13, %v1239_v35, 0.0  ;;  %v1330_v20 = vadd.f32 %v1329_v1, %v1328_v52  ;;  %v1337_v7 = vadd.f32 %v1336_v5, %v1335_v60 }
 0x469   :  { %v1261_v55 = vrot.slane %v1260_v31, 1  ;;  %v1176_v39 = vpop.permute.xlu1 %1175  ;;  %v1348_v40 = vrot.slane %v1347_v57, 4  ;;  %v1287_v3 = vrot.slane %v1286_v42, 2  ;;  %v1292_v36 = vrot.slane %v1291_v48, 4 }
 0x46a   :  { %v1240_v12 = vmul.f32 %v3881_v8, %v1176_v39  ;;  %v1343_v54 = vrot.slane %v1342_v16, 2  ;;  %v1276_v2 = vadd.f32 %v1275_v45, %v1274_v13  ;;  %v4342_v5 = vrot.slane %v3969_v4, 1 }
 0x46b   :  { %v1262_v53 = vadd.f32 %v1261_v55, %v1260_v31  ;;  %v1349_v18 = vadd.f32 %v1348_v40, %v1347_v57  ;;  %v1288_v0 = vadd.f32 %v1287_v3, %v1286_v42  ;;  %v1293_v6 = vadd.f32 %v1292_v36, %v1291_v48 }
 0x46c   :  { %v1298_v27 = vsel %vm945_vm13, %v1240_v12, 0.0  ;;  %v1282_v55 = vrot.slane %v1281_v10, 1  ;;  %v1344_v61 = vadd.f32 %v1343_v54, %v1342_v16  ;;  %v1311_v3 = vadd.f32 %v4342_v5, %v3969_v4 }
 0x46d   :  { %v1369_v28 = vsel %vm1074_vm15, %v1262_v53, %v1255_v51  ;;  %v1232_v37 = vpop.permute.xlu1 %1231  ;;  %v1350_v58 = vrot.slane %v1349_v18, 2  ;;  %v1299_v35 = vrot.slane %v1298_v27, 4  ;;  %v1294_v33 = vrot.slane %v1293_v6, 2 }
 0x46e   :  { %v1370_v31 = vsel %vm1076_vm3, %v1269_v26, %v1369_v28  ;;  %v1248_v39 = vmul.f32 %v3889_v19, %v1232_v37  ;;  %v1289_v57 = vrot.slane %v1288_v0, 1  ;;  %v1324_v51 = vrot.slane %v1323_v34, 1 }
 0x46f   :  { %v1300_v40 = vadd.f32 %v1299_v35, %v1298_v27  ;;  %v1351_v42 = vadd.f32 %v1350_v58, %v1349_v18  ;;  %v1295_v36 = vadd.f32 %v1294_v33, %v1293_v6  ;;  %v1331_v53 = vrot.slane %v1330_v20, 1 }
 0x470   :  { %v1354_v48 = vsel %vm945_vm13, %v1248_v39, 0.0  ;;  %v1371_v52 = vsel %vm1078_vm7, %v1276_v2, %v1370_v31  ;;  %v1338_v12 = vrot.slane %v1337_v7, 1  ;;  %v1283_v26 = vadd.f32 %v1282_v55, %v1281_v10 }
 0x471   :  { %v1301_v60 = vrot.slane %v1300_v40, 2  ;;  %v1355_v1 = vrot.slane %v1354_v48, 4  ;;  %v1296_v13 = vrot.slane %v1295_v36, 1  ;;  %v1345_v16 = vrot.slane %v1344_v61, 1 }
 0x472   :  { %v1290_v45 = vadd.f32 %v1289_v57, %v1288_v0  ;;  %v1325_v18 = vadd.f32 %v1324_v51, %v1323_v34  ;;  %v1372_v33 = vsel %vm1080_vm8, %v1283_v26, %v1371_v52  ;;  %v1352_v6 = vrot.slane %v1351_v42, 1 }
 0x473   :  { %v1302_v54 = vadd.f32 %v1301_v60, %v1300_v40  ;;  %v1356_v28 = vadd.f32 %v1355_v1, %v1354_v48  ;;  %v1297_v27 = vadd.f32 %v1296_v13, %v1295_v36  ;;  %v1332_v37 = vadd.f32 %v1331_v53, %v1330_v20  ;;  %v254_v53 = vld [vmem:[%s4317_s7] sm:$0xf] }
 0x474   :  { %v1457_v31 = vsel %vm1074_vm15, %v3979_v38, %v1311_v3  ;;  %v1339_v39 = vadd.f32 %v1338_v12, %v1337_v7  ;;  %v1346_v4 = vadd.f32 %v1345_v16, %v1344_v61  ;;  %v1373_v0 = vsel %vm1082_vm9, %v1290_v45, %v1372_v33  ;;  %3298 = vmatprep.subr.msk.mxu0 %vm260_vm1, %v254_v53  ;;  %v3413_v3 = vld [vmem:[#allocation3] sm:$0xff]  ;;  %v3166_v12 = vld [vmem:[%s4318_s8] ss:$0 sm:$0xff] }
 0x475   :  { %v1303_v58 = vrot.slane %v1302_v54, 1  ;;  %v1357_v35 = vrot.slane %v1356_v28, 2  ;;  %v1458_v2 = vsel %vm1076_vm3, %v1325_v18, %v1457_v31  ;;  %v1353_v34 = vadd.f32 %v1352_v6, %v1351_v42  ;;  %v3412_v42 = vld [vmem:[%s4311_s1] sm:$0xff] }
 0x476   :  { %v1374_v57 = vsel %vm1084_vm10, %v1297_v27, %v1373_v0  ;;  %v1459_v40 = vsel %vm1078_vm7, %v1332_v37, %v1458_v2  ;;  %v3172_v0 = vld [vmem:[%s4314_s4 + $0x10] sm:$0xff]  ;;  %v3173_v2 = vld [vmem:[%s4314_s4 + $0x18] sm:$0xff] }
 0x477   :  { %v1304_v10 = vadd.f32 %v1303_v58, %v1302_v54  ;;  %v1358_v55 = vadd.f32 %v1357_v35, %v1356_v28  ;;  %v1460_v36 = vsel %vm1080_vm8, %v1339_v39, %v1459_v40  ;;  %v3414_v28 = vld [vmem:[%s4310_s0] sm:$0xff] }
 0x478   :  { %v1461_v7 = vsel %vm1082_vm9, %v1346_v4, %v1460_v36  ;;  %v1676_v36 = vld [vmem:[#allocation6 + $0x18] sm:$0xff] }
 0x479   :  { %v1359_v20 = vrot.slane %v1358_v55, 1  ;;  %v1375_v51 = vsel %vm1086_vm12, %v1304_v10, %v1374_v57  ;;  %v1462_v61 = vsel %vm1084_vm10, %v1353_v34, %v1461_v7  ;;  %v1689_v34 = vrot.slane %v3172_v0, 4  ;;  %v3415_v7 = vld [vmem:[%s4311_s1 + $0x8] sm:$0xff] }
 0x47a   :  { %3291 = vmatmul.mubr.msk.f32.vlgmr.msra.gmra.mrb[4].mxu0 %vm1376_vm14, %v1375_v51  ;;  %v1690_v57 = vrot.slane %v3173_v2, 4  ;;  %v1675_v51 = vld [vmem:[#allocation6 + $0x10] sm:$0xff] }
 0x47b   :  { %v1360_v38 = vadd.f32 %v1359_v20, %v1358_v55  ;;  %3299 = vmatpush3.msk.msra.mxu0 %vm260_vm1, %v254_v53 }
 0x47c   :  { %v1691_v40 = vsel %vm260_vm1, %v1689_v34, %v1690_v57 }
 0x47d   :  { %v1463_v48 = vsel %vm1086_vm12, %v1360_v38, %v1462_v61  ;;  %v3362_v20 = vpack.c.bf16 %v1690_v57, %v1691_v40  ;;  %v3368_v38 = vpack.c.bf16 %v1676_v36, %v1675_v51  ;;  %v3174_v61 = vld [vmem:[%s4316_s6 + $0x4] sm:$0xf] }
 0x47e   :  { %3296 = vmatmul.mubr.msk.f32.vlgmr.msra.gmra.mrb[6].mxu1 %vm1376_vm14, %v1463_v48  ;;  %v4343_v48 = vmov 0.0  }
 0x47f   :  { %3307 = vmatprep.mubr.msk.f32.mxu1 %vm265_vm0, %v3412_v42  ;;  %3364 = vmatprep.subr.msk.bf16.mxu1 %vm3613_vm4, %v3362_v20 }
 0x480   :  { %3367 = vmatpush3.bf16.msk.msra.mxu1 %vm3613_vm4, %v3362_v20  ;;  %3369 = vmatprep.subr.bf16.mxu0 %v3368_v38 }
 0x481   :  { %3310 = vmatprep.subr.msk.mxu1 %vm260_vm1, %v3172_v0 }
 0x483   :  { %3308 = vmatmul.mubr.msk.f32.vlgmr.msra.gmra.mrb[8].mxu1 %vm265_vm0, %v3415_v7  ;;  %vm4344_vm0 = vcmp.eq.s32.totalorder %v3673_v25, 8 }
 0x484   :  { %3311 = vmatpush3.msk.msra.mxu1 %vm260_vm1, %v3172_v0 }
 0x485   :  { %3327 = vmatprep.subr.mxu1 %v4343_v48 }
 0x54d   :  { %v1445_v52 = vpop.f32.mrb[4].mxu0 }
 0x54e   :  { %v3292_v60 = vpop.f32.mrb[5].mxu0  ;;  %3300 = vmatprep.mubr.msk.f32.mxu0 %vm349_vm5, %v1445_v52 }
 0x551   :  { %v1532_v1 = vpop.f32.mrb[6].mxu1 }
 0x552   :  { %v3297_v5 = vpop.f32.mrb[7].mxu1  ;;  %3301 = vmatmul.mubr.msk.f32.vlgmr.msra.gmra.mrb[6].mxu0 %vm349_vm5, %v1532_v1 }
 0x553   :  { %3319 = vmatprep.mubr.msk.f32.mxu0 %vm433_vm2, %v3413_v3  ;;  %3371 = vmatpush3.bf16.msra.mxu0 %v3368_v38 }
 0x554   :  { %3322 = vmatprep.subr.msk.mxu0 %vm260_vm1, %v3174_v61 }
 0x556   :  { %3320 = vmatmul.mubr.msk.f32.vlgmr.msra.gmra.mrb[8].mxu0 %vm433_vm2, %v3416_v11 }
 0x557   :  { %3323 = vmatpush3.msk.msra.mxu0 %vm260_vm1, %v3174_v61  ;;  %3324 = vmatprep.mubr.msk.f32.mxu0 %vm349_vm5, %v3413_v3  ;;  %v3170_v3 = vld [vmem:[%s4319_s9] ss:$0 sm:$0xff] }
 0x558   :  { %3332 = vmatprep.subr.mxu0 %v4343_v48 }
 0x55a   :  { %3325 = vmatmul.mubr.msk.f32.vlgmr.msra.gmra.mrb[10].mxu0 %vm349_vm5, %v3416_v11 }
 0x55b   :  { %3334 = vmatprep.mubr.msk.f32.mxu0 %vm3495_vm6, %v4343_v48 }
 0x625   :  { %v3302_v26 = vpop.f32.mrb[6].mxu0 }
 0x626   :  { %v1623_v13 = vadd.f32 %v3302_v26, %v3166_v12  ;;  %v1617_v16 = vpop.f32.mrb[7].mxu0 }
 0x627   :  { %v1618_v45 = vadd.f32 %v3166_v12, %v1617_v16 }
 0x628   :  { %v1627_v54 = vadd.f32 %v1623_v13, %v3643_v17  ;;  %v3171_v13 = vld [vmem:[%s4320_s10] ss:$0 sm:$0xff] }
 0x629   :  { %v1626_v18 = vadd.f32 %v3414_v28, %v1618_v45 }
 0x62a   :  { %v1631_v33 = vsel %vm349_vm5, %v1627_v54, 0.0 }
 0x62b   :  { %1632 = vadd.xlane.f32.xlu1 %v1631_v33  ;;  %v1628_v6 = vsel %vm349_vm5, %v1626_v18, 0.0 }
 0x62c   :  { %1629 = vadd.xlane.f32.xlu0 %v1628_v6  ;;  %v3321_v6 = vpop.f32.mrb[8].mxu0 }
 0x62d   :  { %3333 = vmatpush3.xpose.msk.msra.mxu0 %vm433_vm2, %v3321_v6 }
 0x62e   :  { %3342 = vmatprep.subr.mxu0 %v4343_v48 }
 0x6b8   :  { %v1633_v27 = vpop.xlane.xlu1 %1632 }
 0x6b9   :  { %v1636_v37 = vmul.f32 0.25, %v1633_v27  ;;  %v1630_v58 = vpop.xlane.xlu0 %1629  ;;  %v1919_v27 = vpop.f32.mrb[9].mxu0 }
 0x6ba   :  { %v1635_v35 = vmul.f32 0.25, %v1630_v58 }
 0x6bb   :  { %v1638_v31 = vsub.f32 %v1627_v54, %v1636_v37  ;;  %v3326_v37 = vpop.f32.mrb[10].mxu0 }
 0x6bc   :  { %v1637_v39 = vsub.f32 %v1626_v18, %v1635_v35  ;;  %v1997_v58 = vpop.f32.mrb[11].mxu0 }
 0x6bd   :  { %v1640_v10 = vmul.f32 %v1638_v31, %v1638_v31 }
 0x6be   :  { %v1639_v4 = vmul.f32 %v1637_v39, %v1637_v39 }
 0x6bf   :  { %v1644_v55 = vsel %vm349_vm5, %v1640_v10, 0.0 }
 0x6c0   :  { %v1641_v17 = vsel %vm349_vm5, %v1639_v4, 0.0 }
 0x6c1   :  { %1642 = vadd.xlane.f32.xlu0 %v1641_v17 }
 0x6c5   :  { %1645 = vadd.xlane.f32.xlu0 %v1644_v55 }
 0x74e   :  { %v1643_v42 = vpop.xlane.xlu0 %1642 }
 0x74f   :  { %v1647_v53 = vmul.f32 0.25, %v1643_v42 }
 0x751   :  { %v1649_v52 = vadd.f32 1e-05, %v1647_v53 }
 0x752   :  { %v1646_v60 = vpop.xlane.xlu0 %1645 }
 0x753   :  { %3396 = vrsqrt.f32 %v1649_v52  ;;  %v1648_v1 = vmul.f32 0.25, %v1646_v60 }
 0x755   :  { %v1650_v5 = vadd.f32 1e-05, %v1648_v1 }
 0x757   :  { %3398 = vrsqrt.f32 %v1650_v5 }
 0x75d   :  { %v3397_v12 = vpop.eup %3396 }
 0x75e   :  { %v1653_v26 = vmul.f32 %v3397_v12, %v1637_v39 }
 0x760   :  { %v1661_v16 = vmul.f32 %v3170_v3, %v1653_v26 }
 0x761   :  { %v3399_v45 = vpop.eup %3398 }
 0x762   :  { %v1654_v54 = vmul.f32 %v3399_v45, %v1638_v31  ;;  %v4069_v28 = vadd.f32 %v3171_v13, %v1661_v16 }
 0x764   :  { %v1662_v18 = vmul.f32 %v3170_v3, %v1654_v54  ;;  %3312 = vmatprep.mubr.msk.f32.mxu1 %vm349_vm5, %v4069_v28 }
 0x766   :  { %v4073_v33 = vadd.f32 %v3171_v13, %v1662_v18 }
 0x768   :  { %3313 = vmatmul.mubr.msk.f32.vlgmr.msra.gmra.mrb[8].mxu1 %vm349_vm5, %v4073_v33 }
 0x769   :  { %3329 = vmatprep.mubr.msk.f32.mxu1 %vm3495_vm6, %v4343_v48  ;;  %3328 = vmatpush3.xpose.msk.msra.mxu1 %vm433_vm2, %v1919_v27 }
 0x76a   :  { %3337 = vmatprep.subr.mxu1 %v4343_v48 }
 0x83b   :  { %v3314_v35 = vpop.f32.mrb[8].mxu1 }
 0x83c   :  { %v1844_v31 = vpop.f32.mrb[9].mxu1  ;;  %3335 = vmatmul.mubr.msk.f32.vlgmr.msra.gmra.mrb[12].mxu0 %vm433_vm2, %v3314_v35 }
 0x83d   :  { %3330 = vmatmul.mubr.msk.f32.vlgmr.msra.gmra.mrb[10].mxu1 %vm433_vm2, %v1844_v31  ;;  %3343 = vmatpush3.msra.mxu0 %v3326_v37 }
 0x83e   :  { %3338 = vmatpush3.msra.mxu1 %v1997_v58  ;;  %3339 = vmatprep.mubr.msk.f32.mxu1 %vm3495_vm6, %v4343_v48 }
 0x83f   :  { %3344 = vmatprep.mubr.msk.f32.mxu0 %vm3495_vm6, %v4343_v48 }
 0x90f   :  { %v2154_v39 = vpop.f32.mrb[12].mxu0 }
 0x910   :  { %v2209_v4 = vcombine.high %v2154_v39, %v2154_v39  ;;  %v2216_v17 = vrot.slane %v2154_v39, %v3735_v62  ;;  %v2078_v10 = vpop.f32.mrb[10].mxu1  ;;  %v3336_v55 = vpop.f32.mrb[13].mxu0 }
 0x911   :  { %v2160_v0 = vcombine.high %v2078_v10, %v2078_v10  ;;  %v2167_v2 = vrot.slane %v2078_v10, %v3735_v62  ;;  %v3331_v34 = vpop.f32.mrb[11].mxu1 }
 0x912   :  { %v2224_v57 = vcombine.high %v2216_v17, %v2216_v17  ;;  %v2232_v40 = vrot.slane %v2216_v17, %v3735_v62  ;;  %v2223_v38 = vrot.slane %v2209_v4, %v3735_v62 }
 0x913   :  { %v2174_v20 = vrot.slane %v2160_v0, %v3735_v62  ;;  %v2175_v51 = vcombine.high %v2167_v2, %v2167_v2  ;;  %v2183_v36 = vrot.slane %v2167_v2, %v3735_v62 }
 0x914   :  { %v2246_v7 = vrot.slane %v2224_v57, %v3735_v62  ;;  %v2254_v61 = vcombine.high %v2232_v40, %v2232_v40  ;;  %v2293_v42 = vrot.slane %v2232_v40, %v3662_v22  ;;  %v2239_v1 = vrot.slane %v2223_v38, %v3735_v62 }
 0x915   :  { %v2197_v48 = vrot.slane %v2175_v51, %v3735_v62  ;;  %v2190_v11 = vrot.slane %v2174_v20, %v3735_v62  ;;  %v2261_v53 = vrot.slane %v2183_v36, %v3662_v22  ;;  %v2176_v3 = vcombine.high %v2174_v20, %v2174_v20 }
 0x916   :  { %v2297_v52 = vrot.slane %v2246_v7, %v3662_v22  ;;  %v2346_v5 = vmul.f32 %v3754_v14, %v2293_v42  ;;  %v2301_v13 = vrot.slane %v2254_v61, %v3662_v22  ;;  %v2205_v37 = vcombine.high %v2183_v36, %v2183_v36 }
 0x917   :  { %v2265_v60 = vrot.slane %v2197_v48, %v3662_v22  ;;  %v2338_v12 = vmul.f32 %v3775_v41, %v2261_v53  ;;  %v2207_v16 = vcombine.high %v2197_v48, %v2197_v48  ;;  %v2277_v6 = vrot.slane %v2190_v11, %v3662_v22 }
 0x918   :  { %v2378_v45 = vsel %vm945_vm13, %v2346_v5, 0.0  ;;  %v2347_v18 = vmul.f32 %v3757_v15, %v2297_v52  ;;  %v2348_v58 = vmul.f32 %v3779_v43, %v2301_v13  ;;  %v2309_v31 = vrot.slane %v2239_v1, %v3662_v22 }
 0x919   :  { %v2339_v26 = vmul.f32 %v3820_v9, %v2265_v60  ;;  %v2354_v54 = vsel %vm945_vm13, %v2338_v12, 0.0  ;;  %2379 = vadd.xlane.f32.xlu0 %v2378_v45  ;;  %v2273_v35 = vrot.slane %v2207_v16, %v3662_v22  ;;  %v2342_v4 = vmul.f32 %v3808_v59, %v2277_v6 }
 0x91a   :  { %2355 = vadd.xlane.f32.xlu1 %v2354_v54  ;;  %v2381_v39 = vsel %vm945_vm13, %v2347_v18, 0.0  ;;  %v2204_v17 = vrot.slane %v2176_v3, %v3735_v62  ;;  %v2225_v10 = vcombine.high %v2223_v38, %v2223_v38  ;;  %v2384_v55 = vsel %vm945_vm13, %v2348_v58, 0.0 }
 0x91b   :  { %v2357_v27 = vsel %vm945_vm13, %v2339_v26, 0.0  ;;  %v2341_v0 = vmul.f32 %v3835_v63, %v2273_v35  ;;  %v2350_v2 = vmul.f32 %v3785_v44, %v2309_v31  ;;  %v2269_v34 = vrot.slane %v2205_v37, %v3662_v22 }
 0x91c   :  { %v2366_v57 = vsel %vm945_vm13, %v2342_v4, 0.0  ;;  %v2281_v40 = vrot.slane %v2204_v17, %v3662_v22  ;;  %v2206_v20 = vcombine.high %v2190_v11, %v2190_v11  ;;  %v2256_v51 = vcombine.high %v2246_v7, %v2246_v7 }
 0x91d   :  { %2358 = vadd.xlane.f32.xlu0 %v2357_v27  ;;  %v2363_v36 = vsel %vm945_vm13, %v2341_v0, 0.0  ;;  %v2390_v38 = vsel %vm945_vm13, %v2350_v2, 0.0  ;;  %v2340_v61 = vmul.f32 %v3801_v56, %v2269_v34  ;;  %v2253_v48 = vrot.slane %v2225_v10, %v3735_v62 }
 0x91e   :  { %2382 = vadd.xlane.f32.xlu1 %v2381_v39  ;;  %v2343_v42 = vmul.f32 %v3855_v49, %v2281_v40  ;;  %v2285_v53 = vrot.slane %v2206_v20, %v3662_v22  ;;  %v2305_v52 = vrot.slane %v2256_v51, %v3662_v22  ;;  %v2208_v60 = vcombine.high %v2204_v17, %v2204_v17 }
 0x91f   :  { %v2360_v7 = vsel %vm945_vm13, %v2340_v61, 0.0  ;;  %v2313_v11 = vrot.slane %v2253_v48, %v3662_v22  ;;  %v2257_v5 = vcombine.high %v2253_v48, %v2253_v48  ;;  %v2255_v12 = vcombine.high %v2239_v1, %v2239_v1 }
 0x920   :  { %v2369_v3 = vsel %vm945_vm13, %v2343_v42, 0.0  ;;  %v2344_v26 = vmul.f32 %v3863_v29, %v2285_v53  ;;  %v2349_v62 = vmul.f32 %v3838_v32, %v2305_v52  ;;  %v2289_v13 = vrot.slane %v2208_v60, %v3662_v22 }
 0x921   :  { %2367 = vadd.xlane.f32.xlu0 %v2366_v57  ;;  %v2351_v16 = vmul.f32 %v3858_v50, %v2313_v11  ;;  %v2321_v45 = vrot.slane %v2257_v5, %v3662_v22  ;;  %v2317_v6 = vrot.slane %v2255_v12, %v3662_v22 }
 0x922   :  { %2385 = vadd.xlane.f32.xlu1 %v2384_v55  ;;  %v2372_v54 = vsel %vm945_vm13, %v2344_v26, 0.0  ;;  %v2387_v18 = vsel %vm945_vm13, %v2349_v62, 0.0  ;;  %v2345_v1 = vmul.f32 %v3881_v8, %v2289_v13 }
 0x923   :  { %v2393_v37 = vsel %vm945_vm13, %v2351_v16, 0.0  ;;  %v2353_v58 = vmul.f32 %v3889_v19, %v2321_v45  ;;  %v2352_v35 = vmul.f32 %v3866_v47, %v2317_v6 }
 0x924   :  { %v2375_v27 = vsel %vm945_vm13, %v2345_v1, 0.0 }
 0x925   :  { %2364 = vadd.xlane.f32.xlu0 %v2363_v36  ;;  %v2399_v31 = vsel %vm945_vm13, %v2353_v58, 0.0  ;;  %v2396_v39 = vsel %vm945_vm13, %v2352_v35, 0.0 }
 0x926   :  { %2391 = vadd.xlane.f32.xlu1 %v2390_v38 }
 0x929   :  { %2370 = vadd.xlane.f32.xlu0 %v2369_v3 }
 0x92a   :  { %2361 = vadd.xlane.f32.xlu1 %v2360_v7 }
 0x92d   :  { %2373 = vadd.xlane.f32.xlu0 %v2372_v54 }
 0x92e   :  { %2388 = vadd.xlane.f32.xlu1 %v2387_v18 }
 0x931   :  { %2376 = vadd.xlane.f32.xlu0 %v2375_v27 }
 0x932   :  { %2394 = vadd.xlane.f32.xlu1 %v2393_v37 }
 0x935   :  { %2400 = vadd.xlane.f32.xlu0 %v2399_v31 }
 0x936   :  { %2397 = vadd.xlane.f32.xlu1 %v2396_v39 }
 0x9a6   :  { %v2380_v4 = vpop.xlane.xlu0 %2379 }
 0x9a7   :  { %v2356_v17 = vpop.xlane.xlu1 %2355  ;;  %v2453_v26 = vrot.slane %v2380_v4, %v3896_v46 }
 0x9a8   :  { %v2421_v20 = vrot.slane %v2356_v17, %v3896_v46 }
 0x9aa   :  { %v2359_v10 = vpop.xlane.xlu0 %2358 }
 0x9ab   :  { %v2383_v55 = vpop.xlane.xlu1 %2382  ;;  %v2425_v40 = vrot.slane %v2359_v10, %v3896_v46 }
 0x9ac   :  { %v2457_v52 = vrot.slane %v2383_v55, %v3896_v46 }
 0x9ad   :  { %v2482_v61 = vsel %vm1074_vm15, %v2425_v40, %v2421_v20 }
 0x9ae   :  { %v2368_v0 = vpop.xlane.xlu0 %2367  ;;  %v2489_v45 = vsel %vm1074_vm15, %v2457_v52, %v2453_v26 }
 0x9af   :  { %v2386_v2 = vpop.xlane.xlu1 %2385  ;;  %v2437_v42 = vrot.slane %v2368_v0, %v3896_v46 }
 0x9b0   :  { %v2461_v5 = vrot.slane %v2386_v2, %v3896_v46 }
 0x9b2   :  { %v2365_v34 = vpop.xlane.xlu0 %2364  ;;  %v2490_v1 = vsel %vm1076_vm3, %v2461_v5, %v2489_v45 }
 0x9b3   :  { %v2392_v57 = vpop.xlane.xlu1 %2391  ;;  %v2433_v48 = vrot.slane %v2365_v34, %v3896_v46 }
 0x9b4   :  { %v2469_v35 = vrot.slane %v2392_v57, %v3896_v46 }
 0x9b6   :  { %v2371_v51 = vpop.xlane.xlu0 %2370 }
 0x9b7   :  { %v2362_v36 = vpop.xlane.xlu1 %2361  ;;  %v2441_v12 = vrot.slane %v2371_v51, %v3896_v46 }
 0x9b8   :  { %v2429_v38 = vrot.slane %v2362_v36, %v3896_v46 }
 0x9ba   :  { %v2483_v53 = vsel %vm1076_vm3, %v2429_v38, %v2482_v61  ;;  %v2374_v7 = vpop.xlane.xlu0 %2373 }
 0x9bb   :  { %v2484_v60 = vsel %vm1078_vm7, %v2433_v48, %v2483_v53  ;;  %v2389_v11 = vpop.xlane.xlu1 %2388  ;;  %v2445_v62 = vrot.slane %v2374_v7, %v3896_v46 }
 0x9bc   :  { %v2485_v3 = vsel %vm1080_vm8, %v2437_v42, %v2484_v60  ;;  %v2465_v13 = vrot.slane %v2389_v11, %v3896_v46 }
 0x9bd   :  { %v2486_v16 = vsel %vm1082_vm9, %v2441_v12, %v2485_v3 }
 0x9be   :  { %v2377_v54 = vpop.xlane.xlu0 %2376  ;;  %v2491_v27 = vsel %vm1078_vm7, %v2465_v13, %v2490_v1  ;;  %v2487_v58 = vsel %vm1084_vm10, %v2445_v62, %v2486_v16  ;;  %v4345_v1 = vld [vmem:[#allocation12_spill] sm:$0xff] }
 0x9bf   :  { %v2395_v18 = vpop.xlane.xlu1 %2394  ;;  %v2449_v6 = vrot.slane %v2377_v54, %v3896_v46  ;;  %v2492_v10 = vsel %vm1080_vm8, %v2469_v35, %v2491_v27 }
 0x9c0   :  { %v2473_v37 = vrot.slane %v2395_v18, %v3896_v46 }
 0x9c1   :  { %v2488_v31 = vsel %vm1086_vm12, %v2449_v6, %v2487_v58 }
 0x9c2   :  { %v2401_v39 = vpop.xlane.xlu0 %2400  ;;  %v2498_v17 = vsel %vm247_vm11, -1e+20, %v2488_v31  ;;  %v2493_v2 = vsel %vm1082_vm9, %v2473_v37, %v2492_v10 }
 0x9c3   :  { %v2398_v4 = vpop.xlane.xlu1 %2397  ;;  %v2500_v0 = vsel %vm349_vm5, %v2498_v17, -inf  ;;  %v2481_v34 = vrot.slane %v2401_v39, %v3896_v46 }
 0x9c4   :  { %v2477_v55 = vrot.slane %v2398_v4, %v3896_v46  ;;  %2501 = vmax.xlane.f32.xlu1 %v2500_v0 }
 0x9c6   :  { %v2494_v57 = vsel %vm1084_vm10, %v2477_v55, %v2493_v2 }
 0x9c7   :  { %v2495_v40 = vsel %vm1086_vm12, %v2481_v34, %v2494_v57 }
 0x9c8   :  { %v2499_v20 = vsel %vm4344_vm0, -1e+20, %v2495_v40 }
 0x9c9   :  { %v2503_v21 = vsel %vm349_vm5, %v2499_v20, -inf }
 0x9ca   :  { %2504 = vmax.xlane.f32.xlu0 %v2503_v21 }
 0xa51   :  { %v2502_v51 = vpop.xlane.xlu1 %2501 }
 0xa52   :  { %v2506_v36 = vsub.f32 %v2498_v17, %v2502_v51 }
 0xa54   :  { %v2508_v38 = vmul.f32 1.442695, %v2506_v36 }
 0xa56   :  { %3400 = vpow2.f32 %v2508_v38 }
 0xa57   :  { %v2505_v61 = vpop.xlane.xlu0 %2504 }
 0xa58   :  { %v2507_v48 = vsub.f32 %v2499_v20, %v2505_v61 }
 0xa5a   :  { %v2510_v42 = vmul.f32 1.442695, %v2507_v48 }
 0xa5c   :  { %3402 = vpow2.f32 %v2510_v42 }
 0xa60   :  { %v3401_v53 = vpop.eup %3400 }
 0xa61   :  { %v2512_v52 = vsel %vm349_vm5, %v3401_v53, 0.0 }
 0xa62   :  { %2513 = vadd.xlane.f32.xlu1 %v2512_v52 }
 0xa66   :  { %v3403_v60 = vpop.eup %3402 }
 0xa67   :  { %v2515_v7 = vsel %vm349_vm5, %v3403_v60, 0.0 }
 0xa68   :  { %2516 = vadd.xlane.f32.xlu0 %v2515_v7 }
 0xaef   :  { %v2514_v25 = vpop.xlane.xlu1 %2513 }
 0xaf0   :  { %3404 = vrcp.f32 %v2514_v25 }
 0xaf5   :  { %v2517_v11 = vpop.xlane.xlu0 %2516 }
 0xaf6   :  { %3406 = vrcp.f32 %v2517_v11 }
 0xafa   :  { %v3405_v5 = vpop.eup %3404 }
 0xafb   :  { %v2519_v12 = vmul.f32 %v3405_v5, %v3401_v53 }
 0xafd   :  { %3111 = vst.msk [vmem:[%s4324_s14] sm:$0xff] %vm349_vm5, %v2519_v12  ;;  %v2525_v45 = vrot.slane %v2519_v12, %v3662_v22  ;;  %v2539_v18 = vrot.slane %v2519_v12, %v3665_v23  ;;  %v2546_v27 = vrot.slane %v2519_v12, %v3684_v30  ;;  %v2532_v37 = vrot.slane %v2519_v12, %v3668_v24 }
 0xafe   :  { %v2553_v58 = vrot.slane %v2519_v12, %v4345_v1 }
 0xb00   :  { %v3407_v3 = vpop.eup %3406 }
 0xb01   :  { %v2521_v26 = vmul.f32 %v3407_v3, %v3403_v60 }
 0xb03   :  { %3112 = vst.msk [vmem:[%s4324_s14 + $0x8] sm:$0xff] %vm349_vm5, %v2521_v26  ;;  %v2588_v62 = vrot.slane %v2521_v26, %v3668_v24  ;;  %v2581_v13 = vrot.slane %v2521_v26, %v3662_v22  ;;  %v2595_v16 = vrot.slane %v2521_v26, %v3665_v23  ;;  %v2602_v54 = vrot.slane %v2521_v26, %v3684_v30  ;;  %v4346_v22 = vld [vmem:[#allocation13_spill] sm:$0xff]  ;;  %v4347_v23 = vld [vmem:[#allocation14_spill] sm:$0xff]  ;;  %v4348_v30 = vld [vmem:[#allocation15_spill] sm:$0xff] }
 0xb04   :  { %v2609_v6 = vrot.slane %v2521_v26, %v4345_v1  ;;  %v2616_v35 = vrot.slane %v2521_v26, %v4346_v22  ;;  %v2560_v31 = vrot.slane %v2519_v12, %v4346_v22  ;;  %v2623_v39 = vrot.slane %v2521_v26, %v4347_v23 }
 0xb05   :  { %2590 = vbcast.lane.b32.xlu0 %v2588_v62, 256  ;;  %2583 = vbcast.lane.b32.xlu1 %v2581_v13, 256  ;;  %v2567_v4 = vrot.slane %v2519_v12, %v4347_v23  ;;  %v2574_v17 = vrot.slane %v2519_v12, %v4348_v30  ;;  %v2630_v24 = vrot.slane %v2521_v26, %v4348_v30 }
 0xb09   :  { %2597 = vbcast.lane.b32.xlu0 %v2595_v16, 256  ;;  %2527 = vbcast.lane.b32.xlu1 %v2525_v45, 256 }
 0xb0d   :  { %2604 = vbcast.lane.b32.xlu0 %v2602_v54, 256  ;;  %2541 = vbcast.lane.b32.xlu1 %v2539_v18, 256 }
 0xb11   :  { %2611 = vbcast.lane.b32.xlu0 %v2609_v6, 256  ;;  %2548 = vbcast.lane.b32.xlu1 %v2546_v27, 256 }
 0xb15   :  { %2534 = vbcast.lane.b32.xlu0 %v2532_v37, 256  ;;  %2555 = vbcast.lane.b32.xlu1 %v2553_v58, 256 }
 0xb19   :  { %2618 = vbcast.lane.b32.xlu0 %v2616_v35, 256  ;;  %2562 = vbcast.lane.b32.xlu1 %v2560_v31, 256 }
 0xb1d   :  { %2625 = vbcast.lane.b32.xlu0 %v2623_v39, 256  ;;  %2569 = vbcast.lane.b32.xlu1 %v2567_v4, 256 }
 0xb21   :  { %2576 = vbcast.lane.b32.xlu1 %v2574_v17, 256 }
 0xb25   :  { %2632 = vbcast.lane.b32.xlu1 %v2630_v24, 256 }
 0xb77   :  { %v2591_v10 = vpop.permute.xlu0 %2590  ;;  %v2584_v55 = vpop.permute.xlu1 %2583 }
 0xb78   :  { %v2643_v0 = vmul.f32 %v3757_v15, %v2591_v10  ;;  %v2642_v2 = vmul.f32 %v3754_v14, %v2584_v55 }
 0xb7a   :  { %v2713_v34 = vsel %vm945_vm13, %v2643_v0, 0.0  ;;  %v2706_v57 = vsel %vm945_vm13, %v2642_v2, 0.0 }
 0xb7b   :  { %v2714_v40 = vrot.slane %v2713_v34, 4  ;;  %v2598_v20 = vpop.permute.xlu0 %2597  ;;  %v2528_v21 = vpop.permute.xlu1 %2527  ;;  %v2707_v51 = vrot.slane %v2706_v57, 4 }
 0xb7c   :  { %v2634_v36 = vmul.f32 %v3775_v41, %v2528_v21  ;;  %v2644_v38 = vmul.f32 %v3779_v43, %v2598_v20 }
 0xb7d   :  { %v2715_v61 = vadd.f32 %v2714_v40, %v2713_v34  ;;  %v2708_v52 = vadd.f32 %v2707_v51, %v2706_v57 }
 0xb7e   :  { %v2650_v48 = vsel %vm945_vm13, %v2634_v36, 0.0  ;;  %v2720_v60 = vsel %vm945_vm13, %v2644_v38, 0.0 }
 0xb7f   :  { %v2651_v42 = vrot.slane %v2650_v48, 4  ;;  %v2605_v53 = vpop.permute.xlu0 %2604  ;;  %v2542_v15 = vpop.permute.xlu1 %2541  ;;  %v2716_v7 = vrot.slane %v2715_v61, 2  ;;  %v2709_v43 = vrot.slane %v2708_v52, 2  ;;  %v2721_v3 = vrot.slane %v2720_v60, 4 }
 0xb80   :  { %v2636_v14 = vmul.f32 %v3801_v56, %v2542_v15  ;;  %v2645_v25 = vmul.f32 %v3838_v32, %v2605_v53 }
 0xb81   :  { %v2652_v5 = vadd.f32 %v2651_v42, %v2650_v48  ;;  %v2717_v16 = vadd.f32 %v2716_v7, %v2715_v61  ;;  %v4226_v6 = vadd.f32 %v2709_v43, %v2708_v52  ;;  %v2722_v27 = vadd.f32 %v2721_v3, %v2720_v60 }
 0xb82   :  { %v2664_v11 = vsel %vm945_vm13, %v2636_v14, 0.0  ;;  %v2727_v56 = vsel %vm945_vm13, %v2645_v25, 0.0 }
 0xb83   :  { %v2612_v41 = vpop.permute.xlu0 %2611  ;;  %v2549_v12 = vpop.permute.xlu1 %2548  ;;  %v2665_v26 = vrot.slane %v2664_v11, 4  ;;  %v2653_v18 = vrot.slane %v2652_v5, 2  ;;  %v2728_v22 = vrot.slane %v2727_v56, 4  ;;  %v2718_v35 = vrot.slane %v2717_v16, 1 }
 0xb84   :  { %v2637_v62 = vmul.f32 %v3835_v63, %v2549_v12  ;;  %v2646_v13 = vmul.f32 %v3785_v44, %v2612_v41  ;;  %v2711_v55 = vrot.slane %v4226_v6, 1  ;;  %v2723_v0 = vrot.slane %v2722_v27, 2 }
 0xb85   :  { %v2666_v45 = vadd.f32 %v2665_v26, %v2664_v11  ;;  %v2654_v4 = vadd.f32 %v2653_v18, %v2652_v5  ;;  %v2729_v34 = vadd.f32 %v2728_v22, %v2727_v56  ;;  %v4236_v20 = vadd.f32 %v2718_v35, %v2717_v16 }
 0xb86   :  { %v2671_v54 = vsel %vm945_vm13, %v2637_v62, 0.0  ;;  %v2734_v63 = vsel %vm945_vm13, %v2646_v13, 0.0  ;;  %v2724_v52 = vadd.f32 %v2723_v0, %v2722_v27 }
 0xb87   :  { %v2535_v32 = vpop.permute.xlu0 %2534  ;;  %v2556_v1 = vpop.permute.xlu1 %2555  ;;  %v2672_v37 = vrot.slane %v2671_v54, 4  ;;  %v2667_v31 = vrot.slane %v2666_v45, 2  ;;  %v2655_v38 = vrot.slane %v2654_v4, 1 }
 0xb88   :  { %v2635_v58 = vmul.f32 %v3820_v9, %v2535_v32  ;;  %v2638_v44 = vmul.f32 %v3808_v59, %v2556_v1  ;;  %v2735_v9 = vrot.slane %v2734_v63, 4 }
 0xb89   :  { %v2673_v23 = vadd.f32 %v2672_v37, %v2671_v54  ;;  %v2668_v21 = vadd.f32 %v2667_v31, %v2666_v45  ;;  %v2656_v3 = vadd.f32 %v2655_v38, %v2654_v4 }
 0xb8a   :  { %v2657_v39 = vsel %vm945_vm13, %v2635_v58, 0.0  ;;  %v2678_v17 = vsel %vm945_vm13, %v2638_v44, 0.0  ;;  %v2736_v14 = vadd.f32 %v2735_v9, %v2734_v63 }
 0xb8b   :  { %v2658_v30 = vrot.slane %v2657_v39, 4  ;;  %v2619_v24 = vpop.permute.xlu0 %2618  ;;  %v2563_v10 = vpop.permute.xlu1 %2562  ;;  %v2679_v2 = vrot.slane %v2678_v17, 4  ;;  %v2674_v51 = vrot.slane %v2673_v23, 2  ;;  %v2669_v5 = vrot.slane %v2668_v21, 1 }
 0xb8c   :  { %v2647_v59 = vmul.f32 %v3858_v50, %v2619_v24  ;;  %v2639_v40 = vmul.f32 %v3855_v49, %v2563_v10  ;;  %v2730_v50 = vrot.slane %v2729_v34, 2  ;;  %v2737_v56 = vrot.slane %v2736_v14, 2 }
 0xb8d   :  { %v2659_v57 = vadd.f32 %v2658_v30, %v2657_v39  ;;  %v2680_v36 = vadd.f32 %v2679_v2, %v2678_v17  ;;  %v2675_v41 = vadd.f32 %v2674_v51, %v2673_v23  ;;  %v2670_v37 = vadd.f32 %v2669_v5, %v2668_v21 }
 0xb8e   :  { %v2741_v48 = vsel %vm945_vm13, %v2647_v59, 0.0  ;;  %v2685_v42 = vsel %vm945_vm13, %v2639_v40, 0.0  ;;  %v2731_v39 = vadd.f32 %v2730_v50, %v2729_v34  ;;  %v2738_v4 = vadd.f32 %v2737_v56, %v2736_v14 }
 0xb8f   :  { %v2660_v61 = vrot.slane %v2659_v57, 2  ;;  %v2626_v53 = vpop.permute.xlu0 %2625  ;;  %v2570_v15 = vpop.permute.xlu1 %2569  ;;  %v2681_v60 = vrot.slane %v2680_v36, 2  ;;  %v2742_v7 = vrot.slane %v2741_v48, 4  ;;  %v2686_v49 = vrot.slane %v2685_v42, 4 }
 0xb90   :  { %v2648_v11 = vmul.f32 %v3866_v47, %v2626_v53  ;;  %v2640_v43 = vmul.f32 %v3863_v29, %v2570_v15  ;;  %v2676_v58 = vrot.slane %v2675_v41, 1  ;;  %v2725_v40 = vrot.slane %v2724_v52, 1 }
 0xb91   :  { %v2661_v25 = vadd.f32 %v2660_v61, %v2659_v57  ;;  %v2743_v12 = vadd.f32 %v2742_v7, %v2741_v48  ;;  %v2687_v62 = vadd.f32 %v2686_v49, %v2685_v42  ;;  %v2682_v45 = vadd.f32 %v2681_v60, %v2680_v36 }
 0xb92   :  { %v2748_v13 = vsel %vm945_vm13, %v2648_v11, 0.0  ;;  %v2692_v18 = vsel %vm945_vm13, %v2640_v43, 0.0  ;;  %v2677_v9 = vadd.f32 %v2676_v58, %v2675_v41  ;;  %v2732_v38 = vrot.slane %v2731_v39, 1 }
 0xb93   :  { %v2662_v26 = vrot.slane %v2661_v25, 1  ;;  %v2577_v16 = vpop.permute.xlu1 %2576  ;;  %v2749_v54 = vrot.slane %v2748_v13, 4  ;;  %v2688_v1 = vrot.slane %v2687_v62, 2  ;;  %v2693_v27 = vrot.slane %v2692_v18, 4 }
 0xb94   :  { %v2641_v47 = vmul.f32 %v3881_v8, %v2577_v16  ;;  %v2744_v22 = vrot.slane %v2743_v12, 2  ;;  %v2683_v10 = vrot.slane %v2682_v45, 1  ;;  %v2712_v42 = vadd.f32 %v2711_v55, %v4226_v6 }
 0xb95   :  { %v2663_v32 = vadd.f32 %v2662_v26, %v2661_v25  ;;  %v2750_v29 = vadd.f32 %v2749_v54, %v2748_v13  ;;  %v2689_v44 = vadd.f32 %v2688_v1, %v2687_v62  ;;  %v2694_v35 = vadd.f32 %v2693_v27, %v2692_v18 }
 0xb96   :  { %v2699_v31 = vsel %vm945_vm13, %v2641_v47, 0.0  ;;  %v2745_v2 = vadd.f32 %v2744_v22, %v2743_v12  ;;  %v2739_v53 = vrot.slane %v2738_v4, 1  ;;  %v2726_v25 = vadd.f32 %v2725_v40, %v2724_v52 }
 0xb97   :  { %v2770_v63 = vsel %vm1074_vm15, %v2663_v32, %v2656_v3  ;;  %v2633_v23 = vpop.permute.xlu1 %2632  ;;  %v2751_v30 = vrot.slane %v2750_v29, 2  ;;  %v2700_v17 = vrot.slane %v2699_v31, 4  ;;  %v2695_v0 = vrot.slane %v2694_v35, 2 }
 0xb98   :  { %v2771_v24 = vsel %vm1076_vm3, %v2670_v37, %v2770_v63  ;;  %v2649_v8 = vmul.f32 %v3889_v19, %v2633_v23  ;;  %v2690_v57 = vrot.slane %v2689_v44, 1  ;;  %v2684_v19 = vadd.f32 %v2683_v10, %v2682_v45  ;;  %v3175_v37 = vld [vmem:[%s4317_s7 + $0x4] sm:$0xf] }
 0xb99   :  { %v2701_v59 = vadd.f32 %v2700_v17, %v2699_v31  ;;  %v2752_v21 = vadd.f32 %v2751_v30, %v2750_v29  ;;  %v2696_v51 = vadd.f32 %v2695_v0, %v2694_v35  ;;  %v2772_v34 = vsel %vm1078_vm7, %v2677_v9, %v2771_v24  ;;  %3347 = vmatprep.subr.msk.mxu1 %vm260_vm1, %v3175_v37 }
 0xb9a   :  { %v2755_v36 = vsel %vm945_vm13, %v2649_v8, 0.0  ;;  %v2746_v14 = vrot.slane %v2745_v2, 1  ;;  %v2691_v60 = vadd.f32 %v2690_v57, %v2689_v44  ;;  %v2773_v49 = vsel %vm1080_vm8, %v2684_v19, %v2772_v34  ;;  %v3196_v44 = vld [vmem:[%s4318_s8 + $0x1] ss:$0 sm:$0xff] }
 0xb9b   :  { %v2702_v61 = vrot.slane %v2701_v59, 2  ;;  %v2756_v48 = vrot.slane %v2755_v36, 4  ;;  %v2697_v15 = vrot.slane %v2696_v51, 1  ;;  %v2753_v11 = vrot.slane %v2752_v21, 1 }
 0xb9c   :  { %v2733_v41 = vadd.f32 %v2732_v38, %v2731_v39  ;;  %v2857_v3 = vsel %vm1074_vm15, %v4236_v20, %v2712_v42  ;;  %v2740_v26 = vadd.f32 %v2739_v53, %v2738_v4  ;;  %v2747_v6 = vadd.f32 %v2746_v14, %v2745_v2  ;;  %v3200_v53 = vld [vmem:[%s4319_s9 + $0x1] ss:$0 sm:$0xff]  ;;  %s3498_s9 = smov [#allocation8]  }
 0xb9d   :  { %v2703_v7 = vadd.f32 %v2702_v61, %v2701_v59  ;;  %v2757_v50 = vadd.f32 %v2756_v48, %v2755_v36  ;;  %v2698_v5 = vadd.f32 %v2697_v15, %v2696_v51  ;;  %v2774_v13 = vsel %vm1082_vm9, %v2691_v60, %v2773_v49  ;;  %v3201_v15 = vld [vmem:[%s4320_s10 + $0x1] ss:$0 sm:$0xff]  ;;  %s3119_s10 = sshll.u32 %s3498_s9, 4  ;;  %s3120_s10 = int_to_ptr.vmem [resolvable:$true] %s3119_s10 }
 0xb9e   :  { %v2858_v16 = vsel %vm1076_vm3, %v2726_v25, %v2857_v3  ;;  %v2754_v56 = vadd.f32 %v2753_v11, %v2752_v21  ;;  %v3203_v3 = vld [vmem:[#allocation2] ss:$0 sm:$0xff]  ;;  %p3466_p3 = scmp.lt.s32.totalorder %s3120_s10, %s3120_s10 }
 0xb9f   :  { %v2704_v12 = vrot.slane %v2703_v7, 1  ;;  %v2758_v43 = vrot.slane %v2757_v50, 2  ;;  %v2775_v52 = vsel %vm1084_vm10, %v2698_v5, %v2774_v13  ;;  %v2859_v45 = vsel %vm1078_vm7, %v2733_v41, %v2858_v16 }
 0xba0   :  { %v2860_v32 = vsel %vm1080_vm8, %v2740_v26, %v2859_v45 }
 0xba1   :  { %v2705_v55 = vadd.f32 %v2704_v12, %v2703_v7  ;;  %v2759_v62 = vadd.f32 %v2758_v43, %v2757_v50  ;;  %v2861_v1 = vsel %vm1082_vm9, %v2747_v6, %v2860_v32  ;;  %v3202_v7 = vld [vmem:[%s4321_s11] ss:$0 sm:$0xff]  ;;  %s3461_s11 = scalar_lea.vmem %s3120_s10, 32 }
 0xba2   :  { %v2862_v27 = vsel %vm1084_vm10, %v2754_v56, %v2861_v1  ;;  %p3462_p2 = scmp.ne.s32.totalorder %s3120_s10, %s3461_s11  ;;  %p3467_p4 = scmp.lt.s32.totalorder %s3461_s11, %s3461_s11 }
 0xba3   :  { %v2760_v54 = vrot.slane %v2759_v62, 1  ;;  %v2776_v18 = vsel %vm1086_vm12, %v2705_v55, %v2775_v52 }
 0xba4   :  { %3340 = vmatmul.mubr.msk.f32.vlgmr.msra.gmra.mrb[12].mxu1 %vm1376_vm14, %v2776_v18  ;;  %p3468_p5 = por %p3467_p4, %p3466_p3 }
 0xba5   :  { %v2761_v20 = vadd.f32 %v2760_v54, %v2759_v62  ;;  %3348 = vmatpush3.msk.msra.mxu1 %vm260_vm1, %v3175_v37  ;;  %vm3109_vm1 = vcmask 58368  }
 0xba6   :  { %p3469_p6 = pnand %p3468_p5, %p3462_p2 }
 0xba7   :  { %v2863_v47 = vsel %vm1086_vm12, %v2761_v20, %v2862_v27 }
 0xba8   :  { %3345 = vmatmul.mubr.msk.f32.vlgmr.msra.gmra.mrb[14].mxu0 %vm1376_vm14, %v2863_v47 }
 0xc77   :  { %v2845_v58 = vpop.f32.mrb[12].mxu1 }
 0xc78   :  { %v3341_v22 = vpop.f32.mrb[13].mxu1  ;;  %3349 = vmatprep.mubr.msk.f32.mxu1 %vm349_vm5, %v2845_v58 }
 0xc7b   :  { %v2932_v29 = vpop.f32.mrb[14].mxu0 }
 0xc7c   :  { %v3346_v63 = vpop.f32.mrb[15].mxu0  ;;  %3350 = vmatmul.mubr.msk.f32.vlgmr.msra.gmra.mrb[14].mxu1 %vm349_vm5, %v2932_v29 }
 0xd4f   :  { %v3351_v35 = vpop.f32.mrb[14].mxu1 }
 0xd50   :  { %v3023_v31 = vadd.f32 %v3351_v35, %v3196_v44  ;;  %v3017_v23 = vpop.f32.mrb[15].mxu1 }
 0xd51   :  { %v3018_v39 = vadd.f32 %v3196_v44, %v3017_v23 }
 0xd52   :  { %v3027_v4 = vadd.f32 %v3023_v31, %v4073_v33 }
 0xd53   :  { %v3026_v30 = vadd.f32 %v3018_v39, %v4069_v28  ;;  %v3497_v28 = vmov 0  }
 0xd54   :  { %v3031_v17 = vsel %vm349_vm5, %v3027_v4, 0.0  ;;  %3386 = vset.pattern.permute.xlu1 %v3497_v28  ;;  %3387 = vset.pattern.permute.xlu0 %v3497_v28 }
 0xd55   :  { %3032 = vadd.xlane.f32.xlu1 %v3031_v17  ;;  %v3028_v24 = vsel %vm349_vm5, %v3026_v30, 0.0 }
 0xd56   :  { %3029 = vadd.xlane.f32.xlu0 %v3028_v24 }
 0xde2   :  { %v3033_v10 = vpop.xlane.xlu1 %3032 }
 0xde3   :  { %v3035_v0 = vmul.f32 0.25, %v3033_v10  ;;  %v3030_v8 = vpop.xlane.xlu0 %3029 }
 0xde4   :  { %v3034_v9 = vmul.f32 0.25, %v3030_v8 }
 0xde5   :  { %v3037_v2 = vsub.f32 %v3027_v4, %v3035_v0 }
 0xde6   :  { %v3036_v57 = vsub.f32 %v3026_v30, %v3034_v9 }
 0xde7   :  { %v3039_v21 = vmul.f32 %v3037_v2, %v3037_v2 }
 0xde8   :  { %v3038_v59 = vmul.f32 %v3036_v57, %v3036_v57 }
 0xde9   :  { %v3043_v33 = vsel %vm349_vm5, %v3039_v21, 0.0 }
 0xdea   :  { %v3040_v40 = vsel %vm349_vm5, %v3038_v59, 0.0 }
 0xdeb   :  { %3041 = vadd.xlane.f32.xlu0 %v3040_v40 }
 0xdef   :  { %3044 = vadd.xlane.f32.xlu0 %v3043_v33 }
 0xe78   :  { %v3042_v51 = vpop.xlane.xlu0 %3041 }
 0xe79   :  { %v3046_v36 = vmul.f32 0.25, %v3042_v51 }
 0xe7b   :  { %v3048_v38 = vadd.f32 1e-05, %v3046_v36 }
 0xe7c   :  { %v3045_v34 = vpop.xlane.xlu0 %3044 }
 0xe7d   :  { %3408 = vrsqrt.f32 %v3048_v38  ;;  %v3047_v61 = vmul.f32 0.25, %v3045_v34 }
 0xe7f   :  { %v3049_v48 = vadd.f32 1e-05, %v3047_v61 }
 0xe81   :  { %3410 = vrsqrt.f32 %v3049_v48 }
 0xe87   :  { %v3409_v42 = vpop.eup %3408 }
 0xe88   :  { %v3052_v19 = vmul.f32 %v3409_v42, %v3036_v57 }
 0xe8a   :  { %v3060_v14 = vmul.f32 %v3200_v53, %v3052_v19 }
 0xe8b   :  { %v3411_v60 = vpop.eup %3410 }
 0xe8c   :  { %v3068_v50 = vadd.f32 %v3201_v15, %v3060_v14  ;;  %v3053_v25 = vmul.f32 %v3411_v60, %v3037_v2 }
 0xe8e   :  { %v3077_v49 = vmul.f32 %v3202_v7, %v3068_v50  ;;  %v3061_v11 = vmul.f32 %v3200_v53, %v3053_v25 }
 0xe90   :  { %v3079_v5 = vsel %vm349_vm5, %v3077_v49, 0.0  ;;  %v3069_v41 = vadd.f32 %v3201_v15, %v3061_v11 }
 0xe91   :  { %3080 = vadd.xlane.f32.xlu1 %v3079_v5 }
 0xe92   :  { %v3078_v12 = vmul.f32 %v3202_v7, %v3069_v41 }
 0xe94   :  { %v3082_v43 = vsel %vm349_vm5, %v3078_v12, 0.0 }
 0xe95   :  { %3083 = vadd.xlane.f32.xlu0 %v3082_v43 }
 0xea2   :  { %3092 = vperm.xlu1 %3386, %v3203_v3  }
 0xf1e   :  { %v3081_v26 = vpop.xlane.xlu1 %3080 }
 0xf22   :  { %v3093_v6 = vpop.permute.xlu1 %3092  ;;  %v3084_v55 = vpop.xlane.xlu0 %3083 }
 0xf23   :  { %v3095_v62 = vadd.f32 %v3093_v6, %v3081_v26  ;;  %v3096_v13 = vadd.f32 %v3093_v6, %v3084_v55 }
 0xf25   :  { %v3102_v16 = vrot.slane %v3095_v62, %v3896_v46  ;;  %v3106_v56 = vrot.slane %v3096_v13, %v3896_v46 }
 0xf27   :  { %v3107_v52 = vsel %vm1074_vm15, %v3106_v56, %v3102_v16 }
 0xf28   :  { %3110 = vst.msk [vmem:[#allocation8] sm:$0x3] %vm3109_vm1, %v3107_v52 }
 0xf29   :  { %3472 = shalt.err (!%p3469_p6)
}
 0xf2a   :  { %s3473_s5 = scalar_lea.hbm %s4323_s13, 32 }
 0xf2b   :  { %p3474_p7 = scmp.ne.s32.totalorder %s4323_s13, %s3473_s5  ;;  %p3477_p8 = scmp.lt.u32.totalorder %s3473_s5, %s4323_s13 }
 0xf2d   :  { %p3479_p9 = pnand %p3477_p8, %p3474_p7 }
 0xf2f   :  { %3482 = shalt.err (!%p3479_p9)
}
 0xf30   :  { %3122 = dma.vmem_to_hbm [thread:$0]  %s3120_s10, 32, %s4323_s13, [#allocation5]  }
 0xf31   :  { %3487 = dma.done.wait [#allocation5], 32  }
 0xf32   :  { %3488 = vsyncadd [#allocation5], 4294967264 }
 0xf33   :  { %3130 = vsyncpa [#allocation4], 1 }
 0xf34   :  { %3131 = vsyncpa [#allocation7], 1 }
 0xf35   :  { %3132 = vsyncpa [#allocation5], 1 }

</bundles_post_ra>
